<compile_context>
chip_gen: v5e
topology: v5e:2x2
jax: 0.10.0
libtpu: 0.0.40
codegen_flags: <defaults>
</compile_context>

<pallas_src>
import jax
import jax.numpy as jnp
from jax import lax
from jax.experimental import pallas as pl
from jax.experimental.pallas import tpu as pltpu


# ---------------------------------------------------------------------------
# Fused Pallas kernel: CenterBlock = BasicBlock o BasicBlock (4 convs)
# ---------------------------------------------------------------------------
def _make_center_block_kernel(H, W, C):
    HW = H * W
    # Tap order t = (dy+1)*3 + (dx+1), matching the (3,3,...) -> (9,...) weight reshape.
    offsets = [(dy, dx) for dy in (-1, 0, 1) for dx in (-1, 0, 1)]
    # For tap (dy,dx) we need result[p] = x_flat[(p + dy*W + dx) mod HW]
    # == roll(x_flat, shift=-(dy*W+dx));  keep the static shift non-negative.
    shifts = [(-(dy * W + dx)) % HW for dy, dx in offsets]

    def kernel(x_ref, w_ref, b_ref, m_ref, o_ref):
        """One batch image per grid step.

        x_ref: (1, C, HW)   input (lane-dense flattened spatial), also the residual
        w_ref: (4, 9, C, C) 4 convs x 9 taps, (Cout, Cin), BN scale folded in
        b_ref: (4, C, 1)    per-conv BN shift (beta - mean*scale), f32
        m_ref: (9, 1, HW)   per-tap in-image validity masks (zero the halo taps)
        o_ref: (1, C, HW)   output
        """
        cdt = x_ref.dtype
        x = x_ref[0]                                    # (C, HW)
        xf = x.astype(jnp.float32)

        def conv_bn(cur, i):
            """3x3 conv (pad=1, stride=1) + folded-BN shift for conv #i -> f32."""
            acc = jnp.zeros((C, HW), jnp.float32)
            for t in range(9):      # TODO(synk): K-fuse taps (K=9*C im2col) for large C
                s = shifts[t]
                shifted = cur if s == 0 else pltpu.roll(cur, shift=s, axis=1)
                tap = shifted * m_ref[t]                # mask wrapped / out-of-image taps
                acc = acc + jnp.dot(w_ref[i, t], tap,
                                    preferred_element_type=jnp.float32)
            return acc + b_ref[i]                       # (C,1) shift, lane broadcast

        # BasicBlock 1:  y = ReLU(BN1(conv1(x)));  z1 = ReLU(BN2(conv2(y)) + x)
        y = jnp.maximum(conv_bn(x, 0), 0.0)
        z1 = jnp.maximum(conv_bn(y.astype(cdt), 1) + xf, 0.0)

        # BasicBlock 2:  y2 = ReLU(BN3(conv3(z1)));  out = ReLU(BN4(conv4(y2)) + z1)
        y2 = jnp.maximum(conv_bn(z1.astype(cdt), 2), 0.0)
        z2 = jnp.maximum(conv_bn(y2.astype(cdt), 3) + z1, 0.0)

        o_ref[0] = z2.astype(o_ref.dtype)

    return kernel


# ---------------------------------------------------------------------------
# Wrapper: fold BN, stack weights, build tap masks, set up BlockSpecs / grid
# ---------------------------------------------------------------------------
def center_block(x_nhwc, params, *, dtype=jnp.float32):
    """CenterBlock.forward on NHWC input via a single fused pallas_call.

    `dtype=jnp.bfloat16` halves HBM traffic and doubles MXU rate on v6e/v7x
    (accumulation and BN shifts stay f32); the demo uses f32 for a tight check.
    """
    N, H, W, C = x_nhwc.shape
    HW = H * W
    p1, p2 = params["block1"], params["block2"]
    convs = [(p1["w1"], p1["s1"], p1["b1"]),
             (p1["w2"], p1["s2"], p1["b2"]),
             (p2["w1"], p2["s1"], p2["b1"]),
             (p2["w2"], p2["s2"], p2["b2"])]

    w_list, b_list = [], []
    for w_hwio, scale, shift in convs:
        # Residual adds require in_ch == out_ch for every conv in CenterBlock.
        assert w_hwio.shape == (3, 3, C, C), "CenterBlock needs in_ch == out_ch"
        wf = (w_hwio * scale).reshape(9, C, C)          # fold BN scale (per out-chan)
        w_list.append(jnp.transpose(wf, (0, 2, 1)))     # (9, Cout, Cin)
        b_list.append(shift.reshape(C, 1))
    w_all = jnp.stack(w_list).astype(dtype)             # (4, 9, C, C)
    b_all = jnp.stack(b_list).astype(jnp.float32)       # (4, C, 1)

    # Per-tap validity masks over the flattened spatial axis (implements padding=1
    # and cancels the roll wrap-around at row/image borders).
    ys = jnp.arange(H).reshape(H, 1)
    xs = jnp.arange(W).reshape(1, W)
    m_list = []
    for dy in (-1, 0, 1):
        for dx in (-1, 0, 1):
            valid = ((ys + dy >= 0) & (ys + dy < H) &
                     (xs + dx >= 0) & (xs + dx < W))
            m_list.append(valid.reshape(1, HW))
    mask_all = jnp.stack(m_list).astype(dtype)          # (9, 1, HW)

    # Lane-dense layout: (N, C, H*W) — H*W (=256 here) sits on the 128-lane axis.
    x_flat = jnp.transpose(x_nhwc, (0, 3, 1, 2)).reshape(N, C, HW).astype(dtype)

    out_flat = pl.pallas_call(
        _make_center_block_kernel(H, W, C),
        out_shape=jax.ShapeDtypeStruct((N, C, HW), dtype),
        grid=(N,),
        in_specs=[
            pl.BlockSpec((1, C, HW), lambda n: (n, 0, 0)),      # x (also the residual)
            pl.BlockSpec((4, 9, C, C), lambda n: (0, 0, 0, 0)),  # all conv weights
            pl.BlockSpec((4, C, 1), lambda n: (0, 0, 0)),        # all BN shifts
            pl.BlockSpec((9, 1, HW), lambda n: (0, 0, 0)),       # tap masks
        ],
        out_specs=pl.BlockSpec((1, C, HW), lambda n: (n, 0, 0)),
        compiler_params=pltpu.CompilerParams(
            dimension_semantics=("parallel",),
            vmem_limit_bytes=32 * 1024 * 1024),
    )(x_flat, w_all, b_all, mask_all)

    return jnp.transpose(out_flat.reshape(N, C, H, W), (0, 2, 3, 1))  # back to NHWC


# ---------------------------------------------------------------------------
# Deterministic parameter init (synthetic; matches nn.Module shapes)
# ---------------------------------------------------------------------------
def make_conv_bn(key, cin, cout, eps=1e-5):
    k1, k2, k3, k4, k5 = jax.random.split(key, 5)
    # Conv2d(cin, cout, 3, bias=False): torch weight (cout, cin, 3, 3) -> HWIO
    w_oihw = jax.random.normal(k1, (cout, cin, 3, 3), jnp.float32) * 0.1
    w_hwio = jnp.transpose(w_oihw, (2, 3, 1, 0))
    # BatchNorm2d(cout) inference params
    gamma = 1.0 + 0.1 * jax.random.normal(k2, (cout,), jnp.float32)
    beta = 0.1 * jax.random.normal(k3, (cout,), jnp.float32)
    mean = 0.1 * jax.random.normal(k4, (cout,), jnp.float32)
    var = jnp.abs(jax.random.normal(k5, (cout,), jnp.float32)) * 0.5 + 0.5
    scale = gamma / jnp.sqrt(var + eps)
    shift = beta - mean * scale
    return w_hwio, scale, shift


def make_basic_block_params(key, inplanes, planes):
    k1, k2 = jax.random.split(key)
    w1, s1, b1 = make_conv_bn(k1, inplanes, planes)
    w2, s2, b2 = make_conv_bn(k2, planes, planes)
    return {"w1": w1, "s1": s1, "b1": b1, "w2": w2, "s2": s2, "b2": b2}


def make_center_block_params(key, in_ch, out_ch):
    k1, k2 = jax.random.split(key)
    return {"block1": make_basic_block_params(k1, in_ch, in_ch),
            "block2": make_basic_block_params(k2, in_ch, out_ch)}


# ---------------------------------------------------------------------------
# Pure-JAX reference (uses the unfolded scale/shift -> independent check)
# ---------------------------------------------------------------------------
def ref_conv_bn(x, w, s, b):
    y = lax.conv_general_dilated(
        x, w, window_strides=(1, 1), padding=((1, 1), (1, 1)),
        dimension_numbers=("NHWC", "HWIO", "NHWC"))
    return y * s + b


def ref_basic_block(x, p):
    y = jnp.maximum(ref_conv_bn(x, p["w1"], p["s1"], p["b1"]), 0.0)
    y = ref_conv_bn(y, p["w2"], p["s2"], p["b2"]) + x
    return jnp.maximum(y, 0.0)


def ref_center_block(x, params):
    return ref_basic_block(ref_basic_block(x, params["block1"]), params["block2"])


# ---------------------------------------------------------------------------
if __name__ == "__main__":
    key = jax.random.PRNGKey(0)
    kx, kp = jax.random.split(key)

    N, C, H, W = 2, 4, 16, 16            # in_ch == out_ch == 4 (residual requires it)
    x_nchw = jax.random.normal(kx, (N, C, H, W), jnp.float32)   # torch-style NCHW input
    x_nhwc = jnp.transpose(x_nchw, (0, 2, 3, 1))                # wrapper layout: NHWC

    params = make_center_block_params(kp, C, C)

    out = jax.block_until_ready(center_block(x_nhwc, params))
    ref = jax.block_until_ready(ref_center_block(x_nhwc, params))

    assert out.shape == (N, H, W, C)
    assert jnp.allclose(out, ref, atol=1e-3, rtol=1e-3), "mismatch vs JAX reference"

    # back to NCHW to match the PyTorch module's output convention
    out_nchw = jnp.transpose(out, (0, 3, 1, 2))
    jax.block_until_ready(out_nchw)
    print("KERNEL_OK")
</pallas_src>

<mosaic_0001>
module attributes {stable_mosaic.version = 11 : i64} {
  func.func @kernel(%arg0: i32, %arg1: memref<1x4x256xf32, #tpu.memory_space<vmem>>, %arg2: memref<4x9x4x4xf32, #tpu.memory_space<vmem>>, %arg3: memref<4x4x1xf32, #tpu.memory_space<vmem>>, %arg4: memref<9x1x256xf32, #tpu.memory_space<vmem>>, %arg5: memref<1x4x256xf32, #tpu.memory_space<vmem>>) attributes {dimension_semantics = [#tpu.dimension_semantics<parallel>], iteration_bounds = array<i64: 2>, scalar_prefetch = 0 : i64, scratch_operands = 0 : i64, tpu.core_type = #tpu.core_type<tc>, window_params = [{transform_indices = @transform_0, window_bounds = array<i64: 1, 4, 256>}, {pipeline_mode = #tpu.pipeline_mode<synchronous>, transform_indices = @transform_1, window_bounds = array<i64: 4, 9, 4, 4>}, {pipeline_mode = #tpu.pipeline_mode<synchronous>, transform_indices = @transform_2, window_bounds = array<i64: 4, 4, 1>}, {pipeline_mode = #tpu.pipeline_mode<synchronous>, transform_indices = @transform_3, window_bounds = array<i64: 9, 1, 256>}, {transform_indices = @transform_4, window_bounds = array<i64: 1, 4, 256>}]} {
    %c0 = arith.constant 0 : index
    %c0_0 = arith.constant 0 : index
    %c0_1 = arith.constant 0 : index
    %0 = vector.load %arg1[%c0, %c0_0, %c0_1] : memref<1x4x256xf32, #tpu.memory_space<vmem>>, vector<1x4x256xf32>
    %1 = vector.shape_cast %0 : vector<1x4x256xf32> to vector<4x256xf32>
    %cst = arith.constant 0.000000e+00 : f32
    %2 = vector.broadcast %cst : f32 to vector<4x256xf32>
    %c17_i32 = arith.constant 17 : i32
    %3 = tpu.dynamic_rotate %1 by %c17_i32 dim 1 : vector<4x256xf32>, i32 -> vector<4x256xf32>
    %c0_2 = arith.constant 0 : index
    %c0_3 = arith.constant 0 : index
    %c0_4 = arith.constant 0 : index
    %4 = vector.load %arg4[%c0_2, %c0_3, %c0_4] : memref<9x1x256xf32, #tpu.memory_space<vmem>>, vector<1x1x256xf32>
    %5 = vector.shape_cast %4 : vector<1x1x256xf32> to vector<1x256xf32>
    %6 = vector.broadcast %5 : vector<1x256xf32> to vector<4x256xf32>
    %7 = arith.mulf %3, %6 : vector<4x256xf32>
    %c0_5 = arith.constant 0 : index
    %c0_6 = arith.constant 0 : index
    %c0_7 = arith.constant 0 : index
    %c0_8 = arith.constant 0 : index
    %8 = vector.load %arg2[%c0_5, %c0_6, %c0_7, %c0_8] : memref<4x9x4x4xf32, #tpu.memory_space<vmem>>, vector<1x1x4x4xf32>
    %9 = vector.shape_cast %8 : vector<1x1x4x4xf32> to vector<4x4xf32>
    %cst_9 = arith.constant dense<0.000000e+00> : vector<4x256xf32>
    %10 = tpu.matmul %9, %7, %cst_9 {dimension_numbers = #tpu.dot_dimension_numbers<[1], [0], [0], [1], [0, 0, 1, 1], [], []>} : vector<4x4xf32>, vector<4x256xf32>, vector<4x256xf32> -> vector<4x256xf32>
    %11 = arith.addf %2, %10 : vector<4x256xf32>
    %c16_i32 = arith.constant 16 : i32
    %12 = tpu.dynamic_rotate %1 by %c16_i32 dim 1 : vector<4x256xf32>, i32 -> vector<4x256xf32>
    %c1 = arith.constant 1 : index
    %c0_10 = arith.constant 0 : index
    %c0_11 = arith.constant 0 : index
    %13 = vector.load %arg4[%c1, %c0_10, %c0_11] : memref<9x1x256xf32, #tpu.memory_space<vmem>>, vector<1x1x256xf32>
    %14 = vector.shape_cast %13 : vector<1x1x256xf32> to vector<1x256xf32>
    %15 = vector.broadcast %14 : vector<1x256xf32> to vector<4x256xf32>
    %16 = arith.mulf %12, %15 : vector<4x256xf32>
    %c0_12 = arith.constant 0 : index
    %c1_13 = arith.constant 1 : index
    %c0_14 = arith.constant 0 : index
    %c0_15 = arith.constant 0 : index
    %17 = vector.load %arg2[%c0_12, %c1_13, %c0_14, %c0_15] : memref<4x9x4x4xf32, #tpu.memory_space<vmem>>, vector<1x1x4x4xf32>
    %18 = vector.shape_cast %17 : vector<1x1x4x4xf32> to vector<4x4xf32>
    %cst_16 = arith.constant dense<0.000000e+00> : vector<4x256xf32>
    %19 = tpu.matmul %18, %16, %cst_16 {dimension_numbers = #tpu.dot_dimension_numbers<[1], [0], [0], [1], [0, 0, 1, 1], [], []>} : vector<4x4xf32>, vector<4x256xf32>, vector<4x256xf32> -> vector<4x256xf32>
    %20 = arith.addf %11, %19 : vector<4x256xf32>
    %c15_i32 = arith.constant 15 : i32
    %21 = tpu.dynamic_rotate %1 by %c15_i32 dim 1 : vector<4x256xf32>, i32 -> vector<4x256xf32>
    %c2 = arith.constant 2 : index
    %c0_17 = arith.constant 0 : index
    %c0_18 = arith.constant 0 : index
    %22 = vector.load %arg4[%c2, %c0_17, %c0_18] : memref<9x1x256xf32, #tpu.memory_space<vmem>>, vector<1x1x256xf32>
    %23 = vector.shape_cast %22 : vector<1x1x256xf32> to vector<1x256xf32>
    %24 = vector.broadcast %23 : vector<1x256xf32> to vector<4x256xf32>
    %25 = arith.mulf %21, %24 : vector<4x256xf32>
    %c0_19 = arith.constant 0 : index
    %c2_20 = arith.constant 2 : index
    %c0_21 = arith.constant 0 : index
    %c0_22 = arith.constant 0 : index
    %26 = vector.load %arg2[%c0_19, %c2_20, %c0_21, %c0_22] : memref<4x9x4x4xf32, #tpu.memory_space<vmem>>, vector<1x1x4x4xf32>
    %27 = vector.shape_cast %26 : vector<1x1x4x4xf32> to vector<4x4xf32>
    %cst_23 = arith.constant dense<0.000000e+00> : vector<4x256xf32>
    %28 = tpu.matmul %27, %25, %cst_23 {dimension_numbers = #tpu.dot_dimension_numbers<[1], [0], [0], [1], [0, 0, 1, 1], [], []>} : vector<4x4xf32>, vector<4x256xf32>, vector<4x256xf32> -> vector<4x256xf32>
    %29 = arith.addf %20, %28 : vector<4x256xf32>
    %c1_i32 = arith.constant 1 : i32
    %30 = tpu.dynamic_rotate %1 by %c1_i32 dim 1 : vector<4x256xf32>, i32 -> vector<4x256xf32>
    %c3 = arith.constant 3 : index
    %c0_24 = arith.constant 0 : index
    %c0_25 = arith.constant 0 : index
    %31 = vector.load %arg4[%c3, %c0_24, %c0_25] : memref<9x1x256xf32, #tpu.memory_space<vmem>>, vector<1x1x256xf32>
    %32 = vector.shape_cast %31 : vector<1x1x256xf32> to vector<1x256xf32>
    %33 = vector.broadcast %32 : vector<1x256xf32> to vector<4x256xf32>
    %34 = arith.mulf %30, %33 : vector<4x256xf32>
    %c0_26 = arith.constant 0 : index
    %c3_27 = arith.constant 3 : index
    %c0_28 = arith.constant 0 : index
    %c0_29 = arith.constant 0 : index
    %35 = vector.load %arg2[%c0_26, %c3_27, %c0_28, %c0_29] : memref<4x9x4x4xf32, #tpu.memory_space<vmem>>, vector<1x1x4x4xf32>
    %36 = vector.shape_cast %35 : vector<1x1x4x4xf32> to vector<4x4xf32>
    %cst_30 = arith.constant dense<0.000000e+00> : vector<4x256xf32>
    %37 = tpu.matmul %36, %34, %cst_30 {dimension_numbers = #tpu.dot_dimension_numbers<[1], [0], [0], [1], [0, 0, 1, 1], [], []>} : vector<4x4xf32>, vector<4x256xf32>, vector<4x256xf32> -> vector<4x256xf32>
    %38 = arith.addf %29, %37 : vector<4x256xf32>
    %c4 = arith.constant 4 : index
    %c0_31 = arith.constant 0 : index
    %c0_32 = arith.constant 0 : index
    %39 = vector.load %arg4[%c4, %c0_31, %c0_32] : memref<9x1x256xf32, #tpu.memory_space<vmem>>, vector<1x1x256xf32>
    %40 = vector.shape_cast %39 : vector<1x1x256xf32> to vector<1x256xf32>
    %41 = vector.broadcast %40 : vector<1x256xf32> to vector<4x256xf32>
    %42 = arith.mulf %1, %41 : vector<4x256xf32>
    %c0_33 = arith.constant 0 : index
    %c4_34 = arith.constant 4 : index
    %c0_35 = arith.constant 0 : index
    %c0_36 = arith.constant 0 : index
    %43 = vector.load %arg2[%c0_33, %c4_34, %c0_35, %c0_36] : memref<4x9x4x4xf32, #tpu.memory_space<vmem>>, vector<1x1x4x4xf32>
    %44 = vector.shape_cast %43 : vector<1x1x4x4xf32> to vector<4x4xf32>
    %cst_37 = arith.constant dense<0.000000e+00> : vector<4x256xf32>
    %45 = tpu.matmul %44, %42, %cst_37 {dimension_numbers = #tpu.dot_dimension_numbers<[1], [0], [0], [1], [0, 0, 1, 1], [], []>} : vector<4x4xf32>, vector<4x256xf32>, vector<4x256xf32> -> vector<4x256xf32>
    %46 = arith.addf %38, %45 : vector<4x256xf32>
    %c255_i32 = arith.constant 255 : i32
    %47 = tpu.dynamic_rotate %1 by %c255_i32 dim 1 : vector<4x256xf32>, i32 -> vector<4x256xf32>
    %c5 = arith.constant 5 : index
    %c0_38 = arith.constant 0 : index
    %c0_39 = arith.constant 0 : index
    %48 = vector.load %arg4[%c5, %c0_38, %c0_39] : memref<9x1x256xf32, #tpu.memory_space<vmem>>, vector<1x1x256xf32>
    %49 = vector.shape_cast %48 : vector<1x1x256xf32> to vector<1x256xf32>
    %50 = vector.broadcast %49 : vector<1x256xf32> to vector<4x256xf32>
    %51 = arith.mulf %47, %50 : vector<4x256xf32>
    %c0_40 = arith.constant 0 : index
    %c5_41 = arith.constant 5 : index
    %c0_42 = arith.constant 0 : index
    %c0_43 = arith.constant 0 : index
    %52 = vector.load %arg2[%c0_40, %c5_41, %c0_42, %c0_43] : memref<4x9x4x4xf32, #tpu.memory_space<vmem>>, vector<1x1x4x4xf32>
    %53 = vector.shape_cast %52 : vector<1x1x4x4xf32> to vector<4x4xf32>
    %cst_44 = arith.constant dense<0.000000e+00> : vector<4x256xf32>
    %54 = tpu.matmul %53, %51, %cst_44 {dimension_numbers = #tpu.dot_dimension_numbers<[1], [0], [0], [1], [0, 0, 1, 1], [], []>} : vector<4x4xf32>, vector<4x256xf32>, vector<4x256xf32> -> vector<4x256xf32>
    %55 = arith.addf %46, %54 : vector<4x256xf32>
    %c241_i32 = arith.constant 241 : i32
    %56 = tpu.dynamic_rotate %1 by %c241_i32 dim 1 : vector<4x256xf32>, i32 -> vector<4x256xf32>
    %c6 = arith.constant 6 : index
    %c0_45 = arith.constant 0 : index
    %c0_46 = arith.constant 0 : index
    %57 = vector.load %arg4[%c6, %c0_45, %c0_46] : memref<9x1x256xf32, #tpu.memory_space<vmem>>, vector<1x1x256xf32>
    %58 = vector.shape_cast %57 : vector<1x1x256xf32> to vector<1x256xf32>
    %59 = vector.broadcast %58 : vector<1x256xf32> to vector<4x256xf32>
    %60 = arith.mulf %56, %59 : vector<4x256xf32>
    %c0_47 = arith.constant 0 : index
    %c6_48 = arith.constant 6 : index
    %c0_49 = arith.constant 0 : index
    %c0_50 = arith.constant 0 : index
    %61 = vector.load %arg2[%c0_47, %c6_48, %c0_49, %c0_50] : memref<4x9x4x4xf32, #tpu.memory_space<vmem>>, vector<1x1x4x4xf32>
    %62 = vector.shape_cast %61 : vector<1x1x4x4xf32> to vector<4x4xf32>
    %cst_51 = arith.constant dense<0.000000e+00> : vector<4x256xf32>
    %63 = tpu.matmul %62, %60, %cst_51 {dimension_numbers = #tpu.dot_dimension_numbers<[1], [0], [0], [1], [0, 0, 1, 1], [], []>} : vector<4x4xf32>, vector<4x256xf32>, vector<4x256xf32> -> vector<4x256xf32>
    %64 = arith.addf %55, %63 : vector<4x256xf32>
    %c240_i32 = arith.constant 240 : i32
    %65 = tpu.dynamic_rotate %1 by %c240_i32 dim 1 : vector<4x256xf32>, i32 -> vector<4x256xf32>
    %c7 = arith.constant 7 : index
    %c0_52 = arith.constant 0 : index
    %c0_53 = arith.constant 0 : index
    %66 = vector.load %arg4[%c7, %c0_52, %c0_53] : memref<9x1x256xf32, #tpu.memory_space<vmem>>, vector<1x1x256xf32>
    %67 = vector.shape_cast %66 : vector<1x1x256xf32> to vector<1x256xf32>
    %68 = vector.broadcast %67 : vector<1x256xf32> to vector<4x256xf32>
    %69 = arith.mulf %65, %68 : vector<4x256xf32>
    %c0_54 = arith.constant 0 : index
    %c7_55 = arith.constant 7 : index
    %c0_56 = arith.constant 0 : index
    %c0_57 = arith.constant 0 : index
    %70 = vector.load %arg2[%c0_54, %c7_55, %c0_56, %c0_57] : memref<4x9x4x4xf32, #tpu.memory_space<vmem>>, vector<1x1x4x4xf32>
    %71 = vector.shape_cast %70 : vector<1x1x4x4xf32> to vector<4x4xf32>
    %cst_58 = arith.constant dense<0.000000e+00> : vector<4x256xf32>
    %72 = tpu.matmul %71, %69, %cst_58 {dimension_numbers = #tpu.dot_dimension_numbers<[1], [0], [0], [1], [0, 0, 1, 1], [], []>} : vector<4x4xf32>, vector<4x256xf32>, vector<4x256xf32> -> vector<4x256xf32>
    %73 = arith.addf %64, %72 : vector<4x256xf32>
    %c239_i32 = arith.constant 239 : i32
    %74 = tpu.dynamic_rotate %1 by %c239_i32 dim 1 : vector<4x256xf32>, i32 -> vector<4x256xf32>
    %c8 = arith.constant 8 : index
    %c0_59 = arith.constant 0 : index
    %c0_60 = arith.constant 0 : index
    %75 = vector.load %arg4[%c8, %c0_59, %c0_60] : memref<9x1x256xf32, #tpu.memory_space<vmem>>, vector<1x1x256xf32>
    %76 = vector.shape_cast %75 : vector<1x1x256xf32> to vector<1x256xf32>
    %77 = vector.broadcast %76 : vector<1x256xf32> to vector<4x256xf32>
    %78 = arith.mulf %74, %77 : vector<4x256xf32>
    %c0_61 = arith.constant 0 : index
    %c8_62 = arith.constant 8 : index
    %c0_63 = arith.constant 0 : index
    %c0_64 = arith.constant 0 : index
    %79 = vector.load %arg2[%c0_61, %c8_62, %c0_63, %c0_64] : memref<4x9x4x4xf32, #tpu.memory_space<vmem>>, vector<1x1x4x4xf32>
    %80 = vector.shape_cast %79 : vector<1x1x4x4xf32> to vector<4x4xf32>
    %cst_65 = arith.constant dense<0.000000e+00> : vector<4x256xf32>
    %81 = tpu.matmul %80, %78, %cst_65 {dimension_numbers = #tpu.dot_dimension_numbers<[1], [0], [0], [1], [0, 0, 1, 1], [], []>} : vector<4x4xf32>, vector<4x256xf32>, vector<4x256xf32> -> vector<4x256xf32>
    %82 = arith.addf %73, %81 : vector<4x256xf32>
    %c0_66 = arith.constant 0 : index
    %c0_67 = arith.constant 0 : index
    %c0_68 = arith.constant 0 : index
    %83 = vector.load %arg3[%c0_66, %c0_67, %c0_68] : memref<4x4x1xf32, #tpu.memory_space<vmem>>, vector<1x4x1xf32>
    %84 = vector.shape_cast %83 : vector<1x4x1xf32> to vector<4x1xf32>
    %85 = vector.broadcast %84 : vector<4x1xf32> to vector<4x256xf32>
    %86 = arith.addf %82, %85 : vector<4x256xf32>
    %cst_69 = arith.constant 0.000000e+00 : f32
    %87 = vector.broadcast %cst_69 : f32 to vector<4x256xf32>
    %88 = arith.maximumf %86, %87 : vector<4x256xf32>
    %cst_70 = arith.constant 0.000000e+00 : f32
    %89 = vector.broadcast %cst_70 : f32 to vector<4x256xf32>
    %c17_i32_71 = arith.constant 17 : i32
    %90 = tpu.dynamic_rotate %88 by %c17_i32_71 dim 1 : vector<4x256xf32>, i32 -> vector<4x256xf32>
    %c0_72 = arith.constant 0 : index
    %c0_73 = arith.constant 0 : index
    %c0_74 = arith.constant 0 : index
    %91 = vector.load %arg4[%c0_72, %c0_73, %c0_74] : memref<9x1x256xf32, #tpu.memory_space<vmem>>, vector<1x1x256xf32>
    %92 = vector.shape_cast %91 : vector<1x1x256xf32> to vector<1x256xf32>
    %93 = vector.broadcast %92 : vector<1x256xf32> to vector<4x256xf32>
    %94 = arith.mulf %90, %93 : vector<4x256xf32>
    %c1_75 = arith.constant 1 : index
    %c0_76 = arith.constant 0 : index
    %c0_77 = arith.constant 0 : index
    %c0_78 = arith.constant 0 : index
    %95 = vector.load %arg2[%c1_75, %c0_76, %c0_77, %c0_78] : memref<4x9x4x4xf32, #tpu.memory_space<vmem>>, vector<1x1x4x4xf32>
    %96 = vector.shape_cast %95 : vector<1x1x4x4xf32> to vector<4x4xf32>
    %cst_79 = arith.constant dense<0.000000e+00> : vector<4x256xf32>
    %97 = tpu.matmul %96, %94, %cst_79 {dimension_numbers = #tpu.dot_dimension_numbers<[1], [0], [0], [1], [0, 0, 1, 1], [], []>} : vector<4x4xf32>, vector<4x256xf32>, vector<4x256xf32> -> vector<4x256xf32>
    %98 = arith.addf %89, %97 : vector<4x256xf32>
    %c16_i32_80 = arith.constant 16 : i32
    %99 = tpu.dynamic_rotate %88 by %c16_i32_80 dim 1 : vector<4x256xf32>, i32 -> vector<4x256xf32>
    %c1_81 = arith.constant 1 : index
    %c0_82 = arith.constant 0 : index
    %c0_83 = arith.constant 0 : index
    %100 = vector.load %arg4[%c1_81, %c0_82, %c0_83] : memref<9x1x256xf32, #tpu.memory_space<vmem>>, vector<1x1x256xf32>
    %101 = vector.shape_cast %100 : vector<1x1x256xf32> to vector<1x256xf32>
    %102 = vector.broadcast %101 : vector<1x256xf32> to vector<4x256xf32>
    %103 = arith.mulf %99, %102 : vector<4x256xf32>
    %c1_84 = arith.constant 1 : index
    %c1_85 = arith.constant 1 : index
    %c0_86 = arith.constant 0 : index
    %c0_87 = arith.constant 0 : index
    %104 = vector.load %arg2[%c1_84, %c1_85, %c0_86, %c0_87] : memref<4x9x4x4xf32, #tpu.memory_space<vmem>>, vector<1x1x4x4xf32>
    %105 = vector.shape_cast %104 : vector<1x1x4x4xf32> to vector<4x4xf32>
    %cst_88 = arith.constant dense<0.000000e+00> : vector<4x256xf32>
    %106 = tpu.matmul %105, %103, %cst_88 {dimension_numbers = #tpu.dot_dimension_numbers<[1], [0], [0], [1], [0, 0, 1, 1], [], []>} : vector<4x4xf32>, vector<4x256xf32>, vector<4x256xf32> -> vector<4x256xf32>
    %107 = arith.addf %98, %106 : vector<4x256xf32>
    %c15_i32_89 = arith.constant 15 : i32
    %108 = tpu.dynamic_rotate %88 by %c15_i32_89 dim 1 : vector<4x256xf32>, i32 -> vector<4x256xf32>
    %c2_90 = arith.constant 2 : index
    %c0_91 = arith.constant 0 : index
    %c0_92 = arith.constant 0 : index
    %109 = vector.load %arg4[%c2_90, %c0_91, %c0_92] : memref<9x1x256xf32, #tpu.memory_space<vmem>>, vector<1x1x256xf32>
    %110 = vector.shape_cast %109 : vector<1x1x256xf32> to vector<1x256xf32>
    %111 = vector.broadcast %110 : vector<1x256xf32> to vector<4x256xf32>
    %112 = arith.mulf %108, %111 : vector<4x256xf32>
    %c1_93 = arith.constant 1 : index
    %c2_94 = arith.constant 2 : index
    %c0_95 = arith.constant 0 : index
    %c0_96 = arith.constant 0 : index
    %113 = vector.load %arg2[%c1_93, %c2_94, %c0_95, %c0_96] : memref<4x9x4x4xf32, #tpu.memory_space<vmem>>, vector<1x1x4x4xf32>
    %114 = vector.shape_cast %113 : vector<1x1x4x4xf32> to vector<4x4xf32>
    %cst_97 = arith.constant dense<0.000000e+00> : vector<4x256xf32>
    %115 = tpu.matmul %114, %112, %cst_97 {dimension_numbers = #tpu.dot_dimension_numbers<[1], [0], [0], [1], [0, 0, 1, 1], [], []>} : vector<4x4xf32>, vector<4x256xf32>, vector<4x256xf32> -> vector<4x256xf32>
    %116 = arith.addf %107, %115 : vector<4x256xf32>
    %c1_i32_98 = arith.constant 1 : i32
    %117 = tpu.dynamic_rotate %88 by %c1_i32_98 dim 1 : vector<4x256xf32>, i32 -> vector<4x256xf32>
    %c3_99 = arith.constant 3 : index
    %c0_100 = arith.constant 0 : index
    %c0_101 = arith.constant 0 : index
    %118 = vector.load %arg4[%c3_99, %c0_100, %c0_101] : memref<9x1x256xf32, #tpu.memory_space<vmem>>, vector<1x1x256xf32>
    %119 = vector.shape_cast %118 : vector<1x1x256xf32> to vector<1x256xf32>
    %120 = vector.broadcast %119 : vector<1x256xf32> to vector<4x256xf32>
    %121 = arith.mulf %117, %120 : vector<4x256xf32>
    %c1_102 = arith.constant 1 : index
    %c3_103 = arith.constant 3 : index
    %c0_104 = arith.constant 0 : index
    %c0_105 = arith.constant 0 : index
    %122 = vector.load %arg2[%c1_102, %c3_103, %c0_104, %c0_105] : memref<4x9x4x4xf32, #tpu.memory_space<vmem>>, vector<1x1x4x4xf32>
    %123 = vector.shape_cast %122 : vector<1x1x4x4xf32> to vector<4x4xf32>
    %cst_106 = arith.constant dense<0.000000e+00> : vector<4x256xf32>
    %124 = tpu.matmul %123, %121, %cst_106 {dimension_numbers = #tpu.dot_dimension_numbers<[1], [0], [0], [1], [0, 0, 1, 1], [], []>} : vector<4x4xf32>, vector<4x256xf32>, vector<4x256xf32> -> vector<4x256xf32>
    %125 = arith.addf %116, %124 : vector<4x256xf32>
    %c4_107 = arith.constant 4 : index
    %c0_108 = arith.constant 0 : index
    %c0_109 = arith.constant 0 : index
    %126 = vector.load %arg4[%c4_107, %c0_108, %c0_109] : memref<9x1x256xf32, #tpu.memory_space<vmem>>, vector<1x1x256xf32>
    %127 = vector.shape_cast %126 : vector<1x1x256xf32> to vector<1x256xf32>
    %128 = vector.broadcast %127 : vector<1x256xf32> to vector<4x256xf32>
    %129 = arith.mulf %88, %128 : vector<4x256xf32>
    %c1_110 = arith.constant 1 : index
    %c4_111 = arith.constant 4 : index
    %c0_112 = arith.constant 0 : index
    %c0_113 = arith.constant 0 : index
    %130 = vector.load %arg2[%c1_110, %c4_111, %c0_112, %c0_113] : memref<4x9x4x4xf32, #tpu.memory_space<vmem>>, vector<1x1x4x4xf32>
    %131 = vector.shape_cast %130 : vector<1x1x4x4xf32> to vector<4x4xf32>
    %cst_114 = arith.constant dense<0.000000e+00> : vector<4x256xf32>
    %132 = tpu.matmul %131, %129, %cst_114 {dimension_numbers = #tpu.dot_dimension_numbers<[1], [0], [0], [1], [0, 0, 1, 1], [], []>} : vector<4x4xf32>, vector<4x256xf32>, vector<4x256xf32> -> vector<4x256xf32>
    %133 = arith.addf %125, %132 : vector<4x256xf32>
    %c255_i32_115 = arith.constant 255 : i32
    %134 = tpu.dynamic_rotate %88 by %c255_i32_115 dim 1 : vector<4x256xf32>, i32 -> vector<4x256xf32>
    %c5_116 = arith.constant 5 : index
    %c0_117 = arith.constant 0 : index
    %c0_118 = arith.constant 0 : index
    %135 = vector.load %arg4[%c5_116, %c0_117, %c0_118] : memref<9x1x256xf32, #tpu.memory_space<vmem>>, vector<1x1x256xf32>
    %136 = vector.shape_cast %135 : vector<1x1x256xf32> to vector<1x256xf32>
    %137 = vector.broadcast %136 : vector<1x256xf32> to vector<4x256xf32>
    %138 = arith.mulf %134, %137 : vector<4x256xf32>
    %c1_119 = arith.constant 1 : index
    %c5_120 = arith.constant 5 : index
    %c0_121 = arith.constant 0 : index
    %c0_122 = arith.constant 0 : index
    %139 = vector.load %arg2[%c1_119, %c5_120, %c0_121, %c0_122] : memref<4x9x4x4xf32, #tpu.memory_space<vmem>>, vector<1x1x4x4xf32>
    %140 = vector.shape_cast %139 : vector<1x1x4x4xf32> to vector<4x4xf32>
    %cst_123 = arith.constant dense<0.000000e+00> : vector<4x256xf32>
    %141 = tpu.matmul %140, %138, %cst_123 {dimension_numbers = #tpu.dot_dimension_numbers<[1], [0], [0], [1], [0, 0, 1, 1], [], []>} : vector<4x4xf32>, vector<4x256xf32>, vector<4x256xf32> -> vector<4x256xf32>
    %142 = arith.addf %133, %141 : vector<4x256xf32>
    %c241_i32_124 = arith.constant 241 : i32
    %143 = tpu.dynamic_rotate %88 by %c241_i32_124 dim 1 : vector<4x256xf32>, i32 -> vector<4x256xf32>
    %c6_125 = arith.constant 6 : index
    %c0_126 = arith.constant 0 : index
    %c0_127 = arith.constant 0 : index
    %144 = vector.load %arg4[%c6_125, %c0_126, %c0_127] : memref<9x1x256xf32, #tpu.memory_space<vmem>>, vector<1x1x256xf32>
    %145 = vector.shape_cast %144 : vector<1x1x256xf32> to vector<1x256xf32>
    %146 = vector.broadcast %145 : vector<1x256xf32> to vector<4x256xf32>
    %147 = arith.mulf %143, %146 : vector<4x256xf32>
    %c1_128 = arith.constant 1 : index
    %c6_129 = arith.constant 6 : index
    %c0_130 = arith.constant 0 : index
    %c0_131 = arith.constant 0 : index
    %148 = vector.load %arg2[%c1_128, %c6_129, %c0_130, %c0_131] : memref<4x9x4x4xf32, #tpu.memory_space<vmem>>, vector<1x1x4x4xf32>
    %149 = vector.shape_cast %148 : vector<1x1x4x4xf32> to vector<4x4xf32>
    %cst_132 = arith.constant dense<0.000000e+00> : vector<4x256xf32>
    %150 = tpu.matmul %149, %147, %cst_132 {dimension_numbers = #tpu.dot_dimension_numbers<[1], [0], [0], [1], [0, 0, 1, 1], [], []>} : vector<4x4xf32>, vector<4x256xf32>, vector<4x256xf32> -> vector<4x256xf32>
    %151 = arith.addf %142, %150 : vector<4x256xf32>
    %c240_i32_133 = arith.constant 240 : i32
    %152 = tpu.dynamic_rotate %88 by %c240_i32_133 dim 1 : vector<4x256xf32>, i32 -> vector<4x256xf32>
    %c7_134 = arith.constant 7 : index
    %c0_135 = arith.constant 0 : index
    %c0_136 = arith.constant 0 : index
    %153 = vector.load %arg4[%c7_134, %c0_135, %c0_136] : memref<9x1x256xf32, #tpu.memory_space<vmem>>, vector<1x1x256xf32>
    %154 = vector.shape_cast %153 : vector<1x1x256xf32> to vector<1x256xf32>
    %155 = vector.broadcast %154 : vector<1x256xf32> to vector<4x256xf32>
    %156 = arith.mulf %152, %155 : vector<4x256xf32>
    %c1_137 = arith.constant 1 : index
    %c7_138 = arith.constant 7 : index
    %c0_139 = arith.constant 0 : index
    %c0_140 = arith.constant 0 : index
    %157 = vector.load %arg2[%c1_137, %c7_138, %c0_139, %c0_140] : memref<4x9x4x4xf32, #tpu.memory_space<vmem>>, vector<1x1x4x4xf32>
    %158 = vector.shape_cast %157 : vector<1x1x4x4xf32> to vector<4x4xf32>
    %cst_141 = arith.constant dense<0.000000e+00> : vector<4x256xf32>
    %159 = tpu.matmul %158, %156, %cst_141 {dimension_numbers = #tpu.dot_dimension_numbers<[1], [0], [0], [1], [0, 0, 1, 1], [], []>} : vector<4x4xf32>, vector<4x256xf32>, vector<4x256xf32> -> vector<4x256xf32>
    %160 = arith.addf %151, %159 : vector<4x256xf32>
    %c239_i32_142 = arith.constant 239 : i32
    %161 = tpu.dynamic_rotate %88 by %c239_i32_142 dim 1 : vector<4x256xf32>, i32 -> vector<4x256xf32>
    %c8_143 = arith.constant 8 : index
    %c0_144 = arith.constant 0 : index
    %c0_145 = arith.constant 0 : index
    %162 = vector.load %arg4[%c8_143, %c0_144, %c0_145] : memref<9x1x256xf32, #tpu.memory_space<vmem>>, vector<1x1x256xf32>
    %163 = vector.shape_cast %162 : vector<1x1x256xf32> to vector<1x256xf32>
    %164 = vector.broadcast %163 : vector<1x256xf32> to vector<4x256xf32>
    %165 = arith.mulf %161, %164 : vector<4x256xf32>
    %c1_146 = arith.constant 1 : index
    %c8_147 = arith.constant 8 : index
    %c0_148 = arith.constant 0 : index
    %c0_149 = arith.constant 0 : index
    %166 = vector.load %arg2[%c1_146, %c8_147, %c0_148, %c0_149] : memref<4x9x4x4xf32, #tpu.memory_space<vmem>>, vector<1x1x4x4xf32>
    %167 = vector.shape_cast %166 : vector<1x1x4x4xf32> to vector<4x4xf32>
    %cst_150 = arith.constant dense<0.000000e+00> : vector<4x256xf32>
    %168 = tpu.matmul %167, %165, %cst_150 {dimension_numbers = #tpu.dot_dimension_numbers<[1], [0], [0], [1], [0, 0, 1, 1], [], []>} : vector<4x4xf32>, vector<4x256xf32>, vector<4x256xf32> -> vector<4x256xf32>
    %169 = arith.addf %160, %168 : vector<4x256xf32>
    %c1_151 = arith.constant 1 : index
    %c0_152 = arith.constant 0 : index
    %c0_153 = arith.constant 0 : index
    %170 = vector.load %arg3[%c1_151, %c0_152, %c0_153] : memref<4x4x1xf32, #tpu.memory_space<vmem>>, vector<1x4x1xf32>
    %171 = vector.shape_cast %170 : vector<1x4x1xf32> to vector<4x1xf32>
    %172 = vector.broadcast %171 : vector<4x1xf32> to vector<4x256xf32>
    %173 = arith.addf %169, %172 : vector<4x256xf32>
    %174 = arith.addf %173, %1 : vector<4x256xf32>
    %cst_154 = arith.constant 0.000000e+00 : f32
    %175 = vector.broadcast %cst_154 : f32 to vector<4x256xf32>
    %176 = arith.maximumf %174, %175 : vector<4x256xf32>
    %cst_155 = arith.constant 0.000000e+00 : f32
    %177 = vector.broadcast %cst_155 : f32 to vector<4x256xf32>
    %c17_i32_156 = arith.constant 17 : i32
    %178 = tpu.dynamic_rotate %176 by %c17_i32_156 dim 1 : vector<4x256xf32>, i32 -> vector<4x256xf32>
    %c0_157 = arith.constant 0 : index
    %c0_158 = arith.constant 0 : index
    %c0_159 = arith.constant 0 : index
    %179 = vector.load %arg4[%c0_157, %c0_158, %c0_159] : memref<9x1x256xf32, #tpu.memory_space<vmem>>, vector<1x1x256xf32>
    %180 = vector.shape_cast %179 : vector<1x1x256xf32> to vector<1x256xf32>
    %181 = vector.broadcast %180 : vector<1x256xf32> to vector<4x256xf32>
    %182 = arith.mulf %178, %181 : vector<4x256xf32>
    %c2_160 = arith.constant 2 : index
    %c0_161 = arith.constant 0 : index
    %c0_162 = arith.constant 0 : index
    %c0_163 = arith.constant 0 : index
    %183 = vector.load %arg2[%c2_160, %c0_161, %c0_162, %c0_163] : memref<4x9x4x4xf32, #tpu.memory_space<vmem>>, vector<1x1x4x4xf32>
    %184 = vector.shape_cast %183 : vector<1x1x4x4xf32> to vector<4x4xf32>
    %cst_164 = arith.constant dense<0.000000e+00> : vector<4x256xf32>
    %185 = tpu.matmul %184, %182, %cst_164 {dimension_numbers = #tpu.dot_dimension_numbers<[1], [0], [0], [1], [0, 0, 1, 1], [], []>} : vector<4x4xf32>, vector<4x256xf32>, vector<4x256xf32> -> vector<4x256xf32>
    %186 = arith.addf %177, %185 : vector<4x256xf32>
    %c16_i32_165 = arith.constant 16 : i32
    %187 = tpu.dynamic_rotate %176 by %c16_i32_165 dim 1 : vector<4x256xf32>, i32 -> vector<4x256xf32>
    %c1_166 = arith.constant 1 : index
    %c0_167 = arith.constant 0 : index
    %c0_168 = arith.constant 0 : index
    %188 = vector.load %arg4[%c1_166, %c0_167, %c0_168] : memref<9x1x256xf32, #tpu.memory_space<vmem>>, vector<1x1x256xf32>
    %189 = vector.shape_cast %188 : vector<1x1x256xf32> to vector<1x256xf32>
    %190 = vector.broadcast %189 : vector<1x256xf32> to vector<4x256xf32>
    %191 = arith.mulf %187, %190 : vector<4x256xf32>
    %c2_169 = arith.constant 2 : index
    %c1_170 = arith.constant 1 : index
    %c0_171 = arith.constant 0 : index
    %c0_172 = arith.constant 0 : index
    %192 = vector.load %arg2[%c2_169, %c1_170, %c0_171, %c0_172] : memref<4x9x4x4xf32, #tpu.memory_space<vmem>>, vector<1x1x4x4xf32>
    %193 = vector.shape_cast %192 : vector<1x1x4x4xf32> to vector<4x4xf32>
    %cst_173 = arith.constant dense<0.000000e+00> : vector<4x256xf32>
    %194 = tpu.matmul %193, %191, %cst_173 {dimension_numbers = #tpu.dot_dimension_numbers<[1], [0], [0], [1], [0, 0, 1, 1], [], []>} : vector<4x4xf32>, vector<4x256xf32>, vector<4x256xf32> -> vector<4x256xf32>
    %195 = arith.addf %186, %194 : vector<4x256xf32>
    %c15_i32_174 = arith.constant 15 : i32
    %196 = tpu.dynamic_rotate %176 by %c15_i32_174 dim 1 : vector<4x256xf32>, i32 -> vector<4x256xf32>
    %c2_175 = arith.constant 2 : index
    %c0_176 = arith.constant 0 : index
    %c0_177 = arith.constant 0 : index
    %197 = vector.load %arg4[%c2_175, %c0_176, %c0_177] : memref<9x1x256xf32, #tpu.memory_space<vmem>>, vector<1x1x256xf32>
    %198 = vector.shape_cast %197 : vector<1x1x256xf32> to vector<1x256xf32>
    %199 = vector.broadcast %198 : vector<1x256xf32> to vector<4x256xf32>
    %200 = arith.mulf %196, %199 : vector<4x256xf32>
    %c2_178 = arith.constant 2 : index
    %c2_179 = arith.constant 2 : index
    %c0_180 = arith.constant 0 : index
    %c0_181 = arith.constant 0 : index
    %201 = vector.load %arg2[%c2_178, %c2_179, %c0_180, %c0_181] : memref<4x9x4x4xf32, #tpu.memory_space<vmem>>, vector<1x1x4x4xf32>
    %202 = vector.shape_cast %201 : vector<1x1x4x4xf32> to vector<4x4xf32>
    %cst_182 = arith.constant dense<0.000000e+00> : vector<4x256xf32>
    %203 = tpu.matmul %202, %200, %cst_182 {dimension_numbers = #tpu.dot_dimension_numbers<[1], [0], [0], [1], [0, 0, 1, 1], [], []>} : vector<4x4xf32>, vector<4x256xf32>, vector<4x256xf32> -> vector<4x256xf32>
    %204 = arith.addf %195, %203 : vector<4x256xf32>
    %c1_i32_183 = arith.constant 1 : i32
    %205 = tpu.dynamic_rotate %176 by %c1_i32_183 dim 1 : vector<4x256xf32>, i32 -> vector<4x256xf32>
    %c3_184 = arith.constant 3 : index
    %c0_185 = arith.constant 0 : index
    %c0_186 = arith.constant 0 : index
    %206 = vector.load %arg4[%c3_184, %c0_185, %c0_186] : memref<9x1x256xf32, #tpu.memory_space<vmem>>, vector<1x1x256xf32>
    %207 = vector.shape_cast %206 : vector<1x1x256xf32> to vector<1x256xf32>
    %208 = vector.broadcast %207 : vector<1x256xf32> to vector<4x256xf32>
    %209 = arith.mulf %205, %208 : vector<4x256xf32>
    %c2_187 = arith.constant 2 : index
    %c3_188 = arith.constant 3 : index
    %c0_189 = arith.constant 0 : index
    %c0_190 = arith.constant 0 : index
    %210 = vector.load %arg2[%c2_187, %c3_188, %c0_189, %c0_190] : memref<4x9x4x4xf32, #tpu.memory_space<vmem>>, vector<1x1x4x4xf32>
    %211 = vector.shape_cast %210 : vector<1x1x4x4xf32> to vector<4x4xf32>
    %cst_191 = arith.constant dense<0.000000e+00> : vector<4x256xf32>
    %212 = tpu.matmul %211, %209, %cst_191 {dimension_numbers = #tpu.dot_dimension_numbers<[1], [0], [0], [1], [0, 0, 1, 1], [], []>} : vector<4x4xf32>, vector<4x256xf32>, vector<4x256xf32> -> vector<4x256xf32>
    %213 = arith.addf %204, %212 : vector<4x256xf32>
    %c4_192 = arith.constant 4 : index
    %c0_193 = arith.constant 0 : index
    %c0_194 = arith.constant 0 : index
    %214 = vector.load %arg4[%c4_192, %c0_193, %c0_194] : memref<9x1x256xf32, #tpu.memory_space<vmem>>, vector<1x1x256xf32>
    %215 = vector.shape_cast %214 : vector<1x1x256xf32> to vector<1x256xf32>
    %216 = vector.broadcast %215 : vector<1x256xf32> to vector<4x256xf32>
    %217 = arith.mulf %176, %216 : vector<4x256xf32>
    %c2_195 = arith.constant 2 : index
    %c4_196 = arith.constant 4 : index
    %c0_197 = arith.constant 0 : index
    %c0_198 = arith.constant 0 : index
    %218 = vector.load %arg2[%c2_195, %c4_196, %c0_197, %c0_198] : memref<4x9x4x4xf32, #tpu.memory_space<vmem>>, vector<1x1x4x4xf32>
    %219 = vector.shape_cast %218 : vector<1x1x4x4xf32> to vector<4x4xf32>
    %cst_199 = arith.constant dense<0.000000e+00> : vector<4x256xf32>
    %220 = tpu.matmul %219, %217, %cst_199 {dimension_numbers = #tpu.dot_dimension_numbers<[1], [0], [0], [1], [0, 0, 1, 1], [], []>} : vector<4x4xf32>, vector<4x256xf32>, vector<4x256xf32> -> vector<4x256xf32>
    %221 = arith.addf %213, %220 : vector<4x256xf32>
    %c255_i32_200 = arith.constant 255 : i32
    %222 = tpu.dynamic_rotate %176 by %c255_i32_200 dim 1 : vector<4x256xf32>, i32 -> vector<4x256xf32>
    %c5_201 = arith.constant 5 : index
    %c0_202 = arith.constant 0 : index
    %c0_203 = arith.constant 0 : index
    %223 = vector.load %arg4[%c5_201, %c0_202, %c0_203] : memref<9x1x256xf32, #tpu.memory_space<vmem>>, vector<1x1x256xf32>
    %224 = vector.shape_cast %223 : vector<1x1x256xf32> to vector<1x256xf32>
    %225 = vector.broadcast %224 : vector<1x256xf32> to vector<4x256xf32>
    %226 = arith.mulf %222, %225 : vector<4x256xf32>
    %c2_204 = arith.constant 2 : index
    %c5_205 = arith.constant 5 : index
    %c0_206 = arith.constant 0 : index
    %c0_207 = arith.constant 0 : index
    %227 = vector.load %arg2[%c2_204, %c5_205, %c0_206, %c0_207] : memref<4x9x4x4xf32, #tpu.memory_space<vmem>>, vector<1x1x4x4xf32>
    %228 = vector.shape_cast %227 : vector<1x1x4x4xf32> to vector<4x4xf32>
    %cst_208 = arith.constant dense<0.000000e+00> : vector<4x256xf32>
    %229 = tpu.matmul %228, %226, %cst_208 {dimension_numbers = #tpu.dot_dimension_numbers<[1], [0], [0], [1], [0, 0, 1, 1], [], []>} : vector<4x4xf32>, vector<4x256xf32>, vector<4x256xf32> -> vector<4x256xf32>
    %230 = arith.addf %221, %229 : vector<4x256xf32>
    %c241_i32_209 = arith.constant 241 : i32
    %231 = tpu.dynamic_rotate %176 by %c241_i32_209 dim 1 : vector<4x256xf32>, i32 -> vector<4x256xf32>
    %c6_210 = arith.constant 6 : index
    %c0_211 = arith.constant 0 : index
    %c0_212 = arith.constant 0 : index
    %232 = vector.load %arg4[%c6_210, %c0_211, %c0_212] : memref<9x1x256xf32, #tpu.memory_space<vmem>>, vector<1x1x256xf32>
    %233 = vector.shape_cast %232 : vector<1x1x256xf32> to vector<1x256xf32>
    %234 = vector.broadcast %233 : vector<1x256xf32> to vector<4x256xf32>
    %235 = arith.mulf %231, %234 : vector<4x256xf32>
    %c2_213 = arith.constant 2 : index
    %c6_214 = arith.constant 6 : index
    %c0_215 = arith.constant 0 : index
    %c0_216 = arith.constant 0 : index
    %236 = vector.load %arg2[%c2_213, %c6_214, %c0_215, %c0_216] : memref<4x9x4x4xf32, #tpu.memory_space<vmem>>, vector<1x1x4x4xf32>
    %237 = vector.shape_cast %236 : vector<1x1x4x4xf32> to vector<4x4xf32>
    %cst_217 = arith.constant dense<0.000000e+00> : vector<4x256xf32>
    %238 = tpu.matmul %237, %235, %cst_217 {dimension_numbers = #tpu.dot_dimension_numbers<[1], [0], [0], [1], [0, 0, 1, 1], [], []>} : vector<4x4xf32>, vector<4x256xf32>, vector<4x256xf32> -> vector<4x256xf32>
    %239 = arith.addf %230, %238 : vector<4x256xf32>
    %c240_i32_218 = arith.constant 240 : i32
    %240 = tpu.dynamic_rotate %176 by %c240_i32_218 dim 1 : vector<4x256xf32>, i32 -> vector<4x256xf32>
    %c7_219 = arith.constant 7 : index
    %c0_220 = arith.constant 0 : index
    %c0_221 = arith.constant 0 : index
    %241 = vector.load %arg4[%c7_219, %c0_220, %c0_221] : memref<9x1x256xf32, #tpu.memory_space<vmem>>, vector<1x1x256xf32>
    %242 = vector.shape_cast %241 : vector<1x1x256xf32> to vector<1x256xf32>
    %243 = vector.broadcast %242 : vector<1x256xf32> to vector<4x256xf32>
    %244 = arith.mulf %240, %243 : vector<4x256xf32>
    %c2_222 = arith.constant 2 : index
    %c7_223 = arith.constant 7 : index
    %c0_224 = arith.constant 0 : index
    %c0_225 = arith.constant 0 : index
    %245 = vector.load %arg2[%c2_222, %c7_223, %c0_224, %c0_225] : memref<4x9x4x4xf32, #tpu.memory_space<vmem>>, vector<1x1x4x4xf32>
    %246 = vector.shape_cast %245 : vector<1x1x4x4xf32> to vector<4x4xf32>
    %cst_226 = arith.constant dense<0.000000e+00> : vector<4x256xf32>
    %247 = tpu.matmul %246, %244, %cst_226 {dimension_numbers = #tpu.dot_dimension_numbers<[1], [0], [0], [1], [0, 0, 1, 1], [], []>} : vector<4x4xf32>, vector<4x256xf32>, vector<4x256xf32> -> vector<4x256xf32>
    %248 = arith.addf %239, %247 : vector<4x256xf32>
    %c239_i32_227 = arith.constant 239 : i32
    %249 = tpu.dynamic_rotate %176 by %c239_i32_227 dim 1 : vector<4x256xf32>, i32 -> vector<4x256xf32>
    %c8_228 = arith.constant 8 : index
    %c0_229 = arith.constant 0 : index
    %c0_230 = arith.constant 0 : index
    %250 = vector.load %arg4[%c8_228, %c0_229, %c0_230] : memref<9x1x256xf32, #tpu.memory_space<vmem>>, vector<1x1x256xf32>
    %251 = vector.shape_cast %250 : vector<1x1x256xf32> to vector<1x256xf32>
    %252 = vector.broadcast %251 : vector<1x256xf32> to vector<4x256xf32>
    %253 = arith.mulf %249, %252 : vector<4x256xf32>
    %c2_231 = arith.constant 2 : index
    %c8_232 = arith.constant 8 : index
    %c0_233 = arith.constant 0 : index
    %c0_234 = arith.constant 0 : index
    %254 = vector.load %arg2[%c2_231, %c8_232, %c0_233, %c0_234] : memref<4x9x4x4xf32, #tpu.memory_space<vmem>>, vector<1x1x4x4xf32>
    %255 = vector.shape_cast %254 : vector<1x1x4x4xf32> to vector<4x4xf32>
    %cst_235 = arith.constant dense<0.000000e+00> : vector<4x256xf32>
    %256 = tpu.matmul %255, %253, %cst_235 {dimension_numbers = #tpu.dot_dimension_numbers<[1], [0], [0], [1], [0, 0, 1, 1], [], []>} : vector<4x4xf32>, vector<4x256xf32>, vector<4x256xf32> -> vector<4x256xf32>
    %257 = arith.addf %248, %256 : vector<4x256xf32>
    %c2_236 = arith.constant 2 : index
    %c0_237 = arith.constant 0 : index
    %c0_238 = arith.constant 0 : index
    %258 = vector.load %arg3[%c2_236, %c0_237, %c0_238] : memref<4x4x1xf32, #tpu.memory_space<vmem>>, vector<1x4x1xf32>
    %259 = vector.shape_cast %258 : vector<1x4x1xf32> to vector<4x1xf32>
    %260 = vector.broadcast %259 : vector<4x1xf32> to vector<4x256xf32>
    %261 = arith.addf %257, %260 : vector<4x256xf32>
    %cst_239 = arith.constant 0.000000e+00 : f32
    %262 = vector.broadcast %cst_239 : f32 to vector<4x256xf32>
    %263 = arith.maximumf %261, %262 : vector<4x256xf32>
    %cst_240 = arith.constant 0.000000e+00 : f32
    %264 = vector.broadcast %cst_240 : f32 to vector<4x256xf32>
    %c17_i32_241 = arith.constant 17 : i32
    %265 = tpu.dynamic_rotate %263 by %c17_i32_241 dim 1 : vector<4x256xf32>, i32 -> vector<4x256xf32>
    %c0_242 = arith.constant 0 : index
    %c0_243 = arith.constant 0 : index
    %c0_244 = arith.constant 0 : index
    %266 = vector.load %arg4[%c0_242, %c0_243, %c0_244] : memref<9x1x256xf32, #tpu.memory_space<vmem>>, vector<1x1x256xf32>
    %267 = vector.shape_cast %266 : vector<1x1x256xf32> to vector<1x256xf32>
    %268 = vector.broadcast %267 : vector<1x256xf32> to vector<4x256xf32>
    %269 = arith.mulf %265, %268 : vector<4x256xf32>
    %c3_245 = arith.constant 3 : index
    %c0_246 = arith.constant 0 : index
    %c0_247 = arith.constant 0 : index
    %c0_248 = arith.constant 0 : index
    %270 = vector.load %arg2[%c3_245, %c0_246, %c0_247, %c0_248] : memref<4x9x4x4xf32, #tpu.memory_space<vmem>>, vector<1x1x4x4xf32>
    %271 = vector.shape_cast %270 : vector<1x1x4x4xf32> to vector<4x4xf32>
    %cst_249 = arith.constant dense<0.000000e+00> : vector<4x256xf32>
    %272 = tpu.matmul %271, %269, %cst_249 {dimension_numbers = #tpu.dot_dimension_numbers<[1], [0], [0], [1], [0, 0, 1, 1], [], []>} : vector<4x4xf32>, vector<4x256xf32>, vector<4x256xf32> -> vector<4x256xf32>
    %273 = arith.addf %264, %272 : vector<4x256xf32>
    %c16_i32_250 = arith.constant 16 : i32
    %274 = tpu.dynamic_rotate %263 by %c16_i32_250 dim 1 : vector<4x256xf32>, i32 -> vector<4x256xf32>
    %c1_251 = arith.constant 1 : index
    %c0_252 = arith.constant 0 : index
    %c0_253 = arith.constant 0 : index
    %275 = vector.load %arg4[%c1_251, %c0_252, %c0_253] : memref<9x1x256xf32, #tpu.memory_space<vmem>>, vector<1x1x256xf32>
    %276 = vector.shape_cast %275 : vector<1x1x256xf32> to vector<1x256xf32>
    %277 = vector.broadcast %276 : vector<1x256xf32> to vector<4x256xf32>
    %278 = arith.mulf %274, %277 : vector<4x256xf32>
    %c3_254 = arith.constant 3 : index
    %c1_255 = arith.constant 1 : index
    %c0_256 = arith.constant 0 : index
    %c0_257 = arith.constant 0 : index
    %279 = vector.load %arg2[%c3_254, %c1_255, %c0_256, %c0_257] : memref<4x9x4x4xf32, #tpu.memory_space<vmem>>, vector<1x1x4x4xf32>
    %280 = vector.shape_cast %279 : vector<1x1x4x4xf32> to vector<4x4xf32>
    %cst_258 = arith.constant dense<0.000000e+00> : vector<4x256xf32>
    %281 = tpu.matmul %280, %278, %cst_258 {dimension_numbers = #tpu.dot_dimension_numbers<[1], [0], [0], [1], [0, 0, 1, 1], [], []>} : vector<4x4xf32>, vector<4x256xf32>, vector<4x256xf32> -> vector<4x256xf32>
    %282 = arith.addf %273, %281 : vector<4x256xf32>
    %c15_i32_259 = arith.constant 15 : i32
    %283 = tpu.dynamic_rotate %263 by %c15_i32_259 dim 1 : vector<4x256xf32>, i32 -> vector<4x256xf32>
    %c2_260 = arith.constant 2 : index
    %c0_261 = arith.constant 0 : index
    %c0_262 = arith.constant 0 : index
    %284 = vector.load %arg4[%c2_260, %c0_261, %c0_262] : memref<9x1x256xf32, #tpu.memory_space<vmem>>, vector<1x1x256xf32>
    %285 = vector.shape_cast %284 : vector<1x1x256xf32> to vector<1x256xf32>
    %286 = vector.broadcast %285 : vector<1x256xf32> to vector<4x256xf32>
    %287 = arith.mulf %283, %286 : vector<4x256xf32>
    %c3_263 = arith.constant 3 : index
    %c2_264 = arith.constant 2 : index
    %c0_265 = arith.constant 0 : index
    %c0_266 = arith.constant 0 : index
    %288 = vector.load %arg2[%c3_263, %c2_264, %c0_265, %c0_266] : memref<4x9x4x4xf32, #tpu.memory_space<vmem>>, vector<1x1x4x4xf32>
    %289 = vector.shape_cast %288 : vector<1x1x4x4xf32> to vector<4x4xf32>
    %cst_267 = arith.constant dense<0.000000e+00> : vector<4x256xf32>
    %290 = tpu.matmul %289, %287, %cst_267 {dimension_numbers = #tpu.dot_dimension_numbers<[1], [0], [0], [1], [0, 0, 1, 1], [], []>} : vector<4x4xf32>, vector<4x256xf32>, vector<4x256xf32> -> vector<4x256xf32>
    %291 = arith.addf %282, %290 : vector<4x256xf32>
    %c1_i32_268 = arith.constant 1 : i32
    %292 = tpu.dynamic_rotate %263 by %c1_i32_268 dim 1 : vector<4x256xf32>, i32 -> vector<4x256xf32>
    %c3_269 = arith.constant 3 : index
    %c0_270 = arith.constant 0 : index
    %c0_271 = arith.constant 0 : index
    %293 = vector.load %arg4[%c3_269, %c0_270, %c0_271] : memref<9x1x256xf32, #tpu.memory_space<vmem>>, vector<1x1x256xf32>
    %294 = vector.shape_cast %293 : vector<1x1x256xf32> to vector<1x256xf32>
    %295 = vector.broadcast %294 : vector<1x256xf32> to vector<4x256xf32>
    %296 = arith.mulf %292, %295 : vector<4x256xf32>
    %c3_272 = arith.constant 3 : index
    %c3_273 = arith.constant 3 : index
    %c0_274 = arith.constant 0 : index
    %c0_275 = arith.constant 0 : index
    %297 = vector.load %arg2[%c3_272, %c3_273, %c0_274, %c0_275] : memref<4x9x4x4xf32, #tpu.memory_space<vmem>>, vector<1x1x4x4xf32>
    %298 = vector.shape_cast %297 : vector<1x1x4x4xf32> to vector<4x4xf32>
    %cst_276 = arith.constant dense<0.000000e+00> : vector<4x256xf32>
    %299 = tpu.matmul %298, %296, %cst_276 {dimension_numbers = #tpu.dot_dimension_numbers<[1], [0], [0], [1], [0, 0, 1, 1], [], []>} : vector<4x4xf32>, vector<4x256xf32>, vector<4x256xf32> -> vector<4x256xf32>
    %300 = arith.addf %291, %299 : vector<4x256xf32>
    %c4_277 = arith.constant 4 : index
    %c0_278 = arith.constant 0 : index
    %c0_279 = arith.constant 0 : index
    %301 = vector.load %arg4[%c4_277, %c0_278, %c0_279] : memref<9x1x256xf32, #tpu.memory_space<vmem>>, vector<1x1x256xf32>
    %302 = vector.shape_cast %301 : vector<1x1x256xf32> to vector<1x256xf32>
    %303 = vector.broadcast %302 : vector<1x256xf32> to vector<4x256xf32>
    %304 = arith.mulf %263, %303 : vector<4x256xf32>
    %c3_280 = arith.constant 3 : index
    %c4_281 = arith.constant 4 : index
    %c0_282 = arith.constant 0 : index
    %c0_283 = arith.constant 0 : index
    %305 = vector.load %arg2[%c3_280, %c4_281, %c0_282, %c0_283] : memref<4x9x4x4xf32, #tpu.memory_space<vmem>>, vector<1x1x4x4xf32>
    %306 = vector.shape_cast %305 : vector<1x1x4x4xf32> to vector<4x4xf32>
    %cst_284 = arith.constant dense<0.000000e+00> : vector<4x256xf32>
    %307 = tpu.matmul %306, %304, %cst_284 {dimension_numbers = #tpu.dot_dimension_numbers<[1], [0], [0], [1], [0, 0, 1, 1], [], []>} : vector<4x4xf32>, vector<4x256xf32>, vector<4x256xf32> -> vector<4x256xf32>
    %308 = arith.addf %300, %307 : vector<4x256xf32>
    %c255_i32_285 = arith.constant 255 : i32
    %309 = tpu.dynamic_rotate %263 by %c255_i32_285 dim 1 : vector<4x256xf32>, i32 -> vector<4x256xf32>
    %c5_286 = arith.constant 5 : index
    %c0_287 = arith.constant 0 : index
    %c0_288 = arith.constant 0 : index
    %310 = vector.load %arg4[%c5_286, %c0_287, %c0_288] : memref<9x1x256xf32, #tpu.memory_space<vmem>>, vector<1x1x256xf32>
    %311 = vector.shape_cast %310 : vector<1x1x256xf32> to vector<1x256xf32>
    %312 = vector.broadcast %311 : vector<1x256xf32> to vector<4x256xf32>
    %313 = arith.mulf %309, %312 : vector<4x256xf32>
    %c3_289 = arith.constant 3 : index
    %c5_290 = arith.constant 5 : index
    %c0_291 = arith.constant 0 : index
    %c0_292 = arith.constant 0 : index
    %314 = vector.load %arg2[%c3_289, %c5_290, %c0_291, %c0_292] : memref<4x9x4x4xf32, #tpu.memory_space<vmem>>, vector<1x1x4x4xf32>
    %315 = vector.shape_cast %314 : vector<1x1x4x4xf32> to vector<4x4xf32>
    %cst_293 = arith.constant dense<0.000000e+00> : vector<4x256xf32>
    %316 = tpu.matmul %315, %313, %cst_293 {dimension_numbers = #tpu.dot_dimension_numbers<[1], [0], [0], [1], [0, 0, 1, 1], [], []>} : vector<4x4xf32>, vector<4x256xf32>, vector<4x256xf32> -> vector<4x256xf32>
    %317 = arith.addf %308, %316 : vector<4x256xf32>
    %c241_i32_294 = arith.constant 241 : i32
    %318 = tpu.dynamic_rotate %263 by %c241_i32_294 dim 1 : vector<4x256xf32>, i32 -> vector<4x256xf32>
    %c6_295 = arith.constant 6 : index
    %c0_296 = arith.constant 0 : index
    %c0_297 = arith.constant 0 : index
    %319 = vector.load %arg4[%c6_295, %c0_296, %c0_297] : memref<9x1x256xf32, #tpu.memory_space<vmem>>, vector<1x1x256xf32>
    %320 = vector.shape_cast %319 : vector<1x1x256xf32> to vector<1x256xf32>
    %321 = vector.broadcast %320 : vector<1x256xf32> to vector<4x256xf32>
    %322 = arith.mulf %318, %321 : vector<4x256xf32>
    %c3_298 = arith.constant 3 : index
    %c6_299 = arith.constant 6 : index
    %c0_300 = arith.constant 0 : index
    %c0_301 = arith.constant 0 : index
    %323 = vector.load %arg2[%c3_298, %c6_299, %c0_300, %c0_301] : memref<4x9x4x4xf32, #tpu.memory_space<vmem>>, vector<1x1x4x4xf32>
    %324 = vector.shape_cast %323 : vector<1x1x4x4xf32> to vector<4x4xf32>
    %cst_302 = arith.constant dense<0.000000e+00> : vector<4x256xf32>
    %325 = tpu.matmul %324, %322, %cst_302 {dimension_numbers = #tpu.dot_dimension_numbers<[1], [0], [0], [1], [0, 0, 1, 1], [], []>} : vector<4x4xf32>, vector<4x256xf32>, vector<4x256xf32> -> vector<4x256xf32>
    %326 = arith.addf %317, %325 : vector<4x256xf32>
    %c240_i32_303 = arith.constant 240 : i32
    %327 = tpu.dynamic_rotate %263 by %c240_i32_303 dim 1 : vector<4x256xf32>, i32 -> vector<4x256xf32>
    %c7_304 = arith.constant 7 : index
    %c0_305 = arith.constant 0 : index
    %c0_306 = arith.constant 0 : index
    %328 = vector.load %arg4[%c7_304, %c0_305, %c0_306] : memref<9x1x256xf32, #tpu.memory_space<vmem>>, vector<1x1x256xf32>
    %329 = vector.shape_cast %328 : vector<1x1x256xf32> to vector<1x256xf32>
    %330 = vector.broadcast %329 : vector<1x256xf32> to vector<4x256xf32>
    %331 = arith.mulf %327, %330 : vector<4x256xf32>
    %c3_307 = arith.constant 3 : index
    %c7_308 = arith.constant 7 : index
    %c0_309 = arith.constant 0 : index
    %c0_310 = arith.constant 0 : index
    %332 = vector.load %arg2[%c3_307, %c7_308, %c0_309, %c0_310] : memref<4x9x4x4xf32, #tpu.memory_space<vmem>>, vector<1x1x4x4xf32>
    %333 = vector.shape_cast %332 : vector<1x1x4x4xf32> to vector<4x4xf32>
    %cst_311 = arith.constant dense<0.000000e+00> : vector<4x256xf32>
    %334 = tpu.matmul %333, %331, %cst_311 {dimension_numbers = #tpu.dot_dimension_numbers<[1], [0], [0], [1], [0, 0, 1, 1], [], []>} : vector<4x4xf32>, vector<4x256xf32>, vector<4x256xf32> -> vector<4x256xf32>
    %335 = arith.addf %326, %334 : vector<4x256xf32>
    %c239_i32_312 = arith.constant 239 : i32
    %336 = tpu.dynamic_rotate %263 by %c239_i32_312 dim 1 : vector<4x256xf32>, i32 -> vector<4x256xf32>
    %c8_313 = arith.constant 8 : index
    %c0_314 = arith.constant 0 : index
    %c0_315 = arith.constant 0 : index
    %337 = vector.load %arg4[%c8_313, %c0_314, %c0_315] : memref<9x1x256xf32, #tpu.memory_space<vmem>>, vector<1x1x256xf32>
    %338 = vector.shape_cast %337 : vector<1x1x256xf32> to vector<1x256xf32>
    %339 = vector.broadcast %338 : vector<1x256xf32> to vector<4x256xf32>
    %340 = arith.mulf %336, %339 : vector<4x256xf32>
    %c3_316 = arith.constant 3 : index
    %c8_317 = arith.constant 8 : index
    %c0_318 = arith.constant 0 : index
    %c0_319 = arith.constant 0 : index
    %341 = vector.load %arg2[%c3_316, %c8_317, %c0_318, %c0_319] : memref<4x9x4x4xf32, #tpu.memory_space<vmem>>, vector<1x1x4x4xf32>
    %342 = vector.shape_cast %341 : vector<1x1x4x4xf32> to vector<4x4xf32>
    %cst_320 = arith.constant dense<0.000000e+00> : vector<4x256xf32>
    %343 = tpu.matmul %342, %340, %cst_320 {dimension_numbers = #tpu.dot_dimension_numbers<[1], [0], [0], [1], [0, 0, 1, 1], [], []>} : vector<4x4xf32>, vector<4x256xf32>, vector<4x256xf32> -> vector<4x256xf32>
    %344 = arith.addf %335, %343 : vector<4x256xf32>
    %c3_321 = arith.constant 3 : index
    %c0_322 = arith.constant 0 : index
    %c0_323 = arith.constant 0 : index
    %345 = vector.load %arg3[%c3_321, %c0_322, %c0_323] : memref<4x4x1xf32, #tpu.memory_space<vmem>>, vector<1x4x1xf32>
    %346 = vector.shape_cast %345 : vector<1x4x1xf32> to vector<4x1xf32>
    %347 = vector.broadcast %346 : vector<4x1xf32> to vector<4x256xf32>
    %348 = arith.addf %344, %347 : vector<4x256xf32>
    %349 = arith.addf %348, %176 : vector<4x256xf32>
    %cst_324 = arith.constant 0.000000e+00 : f32
    %350 = vector.broadcast %cst_324 : f32 to vector<4x256xf32>
    %351 = arith.maximumf %349, %350 : vector<4x256xf32>
    %c0_325 = arith.constant 0 : index
    %c0_326 = arith.constant 0 : index
    %c0_327 = arith.constant 0 : index
    %352 = vector.load %arg5[%c0_325, %c0_326, %c0_327] : memref<1x4x256xf32, #tpu.memory_space<vmem>>, vector<1x4x256xf32>
    %353 = vector.shape_cast %352 : vector<1x4x256xf32> to vector<4x256xf32>
    %354 = vector.shape_cast %351 : vector<4x256xf32> to vector<1x4x256xf32>
    tpu.vector_store %arg5[%c0_325, %c0_326, %c0_327], %354 {strides = array<i32>} : memref<1x4x256xf32, #tpu.memory_space<vmem>>, vector<1x4x256xf32>,
    return
  }
  func.func @transform_0(%arg0: i32) -> (i32, i32, i32) {
    %c0_i32 = arith.constant 0 : i32
    %c0_i32_0 = arith.constant 0 : i32
    %c0_i32_1 = arith.constant 0 : i32
    return %arg0, %c0_i32, %c0_i32_0 : i32, i32, i32
  }
  func.func @transform_1(%arg0: i32) -> (i32, i32, i32, i32) {
    %c0_i32 = arith.constant 0 : i32
    %c0_i32_0 = arith.constant 0 : i32
    %c0_i32_1 = arith.constant 0 : i32
    %c0_i32_2 = arith.constant 0 : i32
    %c0_i32_3 = arith.constant 0 : i32
    return %c0_i32, %c0_i32_0, %c0_i32_1, %c0_i32_2 : i32, i32, i32, i32
  }
  func.func @transform_2(%arg0: i32) -> (i32, i32, i32) {
    %c0_i32 = arith.constant 0 : i32
    %c0_i32_0 = arith.constant 0 : i32
    %c0_i32_1 = arith.constant 0 : i32
    %c0_i32_2 = arith.constant 0 : i32
    return %c0_i32, %c0_i32_0, %c0_i32_1 : i32, i32, i32
  }
  func.func @transform_3(%arg0: i32) -> (i32, i32, i32) {
    %c0_i32 = arith.constant 0 : i32
    %c0_i32_0 = arith.constant 0 : i32
    %c0_i32_1 = arith.constant 0 : i32
    %c0_i32_2 = arith.constant 0 : i32
    return %c0_i32, %c0_i32_0, %c0_i32_1 : i32, i32, i32
  }
  func.func @transform_4(%arg0: i32) -> (i32, i32, i32) {
    %c0_i32 = arith.constant 0 : i32
    %c0_i32_0 = arith.constant 0 : i32
    %c0_i32_1 = arith.constant 0 : i32
    return %arg0, %c0_i32, %c0_i32_0 : i32, i32, i32
  }
}

</mosaic_0001>

<bundles_post_ra>
// kernel: tpu_custom_call.1
= control target key start
LH: loop header
LB: loop body
LE: loop exit
PB: predicated region body
PF: predicated region fallthrough
CT: control target
= control target key end

     0   :  { %9 = vsyncpa [#allocation3], 0  ;;  %s3676_s0 = inlined_call_operand.vmem [shape: f32[2,4,256], index: 0, kind: input, shape index: {}]   ;;  %s3677_s1 = inlined_call_operand.vmem [shape: f32[4,9,4,4], index: 1, kind: input, shape index: {}]   ;;  %s3678_s2 = inlined_call_operand.vmem [shape: f32[4,4,1], index: 2, kind: input, shape index: {}]   ;;  %s3679_s3 = inlined_call_operand.vmem [shape: f32[9,1,256], index: 3, kind: input, shape index: {}]   ;;  %s3680_s4 = inlined_call_operand.hbm [shape: f32[2,4,256], index: 4, kind: output, shape index: {}]  }
   0x1   :  { %11 = vsyncpa [#allocation3 + $0x1], 0  ;;  %s2958_s15 = smov 0   ;;  %s2960_s16 = smov 0  }
   0x2   :  { %s2962_s17 = smov 0   ;;  %s2964_s18 = smov 0  }
   0x3 LB: > { %s2979_s19 = sadd.s32 4294967295, %s2922_s18   ;;  %s2605_s20 = sadd.s32 4294967294, %s2922_s18   ;;  %s2922_s18 = sphi %s2964_s18, %s3686_s18   ;;  %s2918_s17 = sphi %s2962_s17, %s3685_s17   ;;  %s2914_s16 = sphi %s2960_s16, %s3684_s16   ;;  %s2910_s15 = sphi %s2958_s15, %s3683_s15  }
   0x4   : > { %s2983_s21 = sadd.s32 1, %s2922_s18   ;;  %s113_s22 = sadd.s32 1, %s2918_s17 }
   0x5   : > { %s110_s23 = ssub.s32 %s2922_s18, %s2983_s21  ;;  %p123_p0 = scmp.ne.s32.totalorder %s2918_s17, %s2914_s16 }
   0x6   : > { %p111_p1 = scmp.eq.s32.totalorder %s110_s23, 0  ;;  %p124_p2 = scmp.eq.s32.totalorder %s2979_s19, 1 }
   0x7   : > { %p129_p3 = scmp.ne.s32.totalorder %s2914_s16, %s2910_s15  ;;  %p130_p4 = scmp.eq.s32.totalorder %s2605_s20, 1 }
   0x8   : > { %s2994_s24 = scalar_select %p111_p1, %s2918_s17, %s113_s22  }
   0x9   : > { %p2996_p5 = por %p124_p2, %p123_p0  ;;  %p3000_p6 = por %p130_p4, %p129_p3 }
   0xa   : > { %p2608_p7 = scmp.ge.s32.totalorder %s2922_s18, 1  ;;  %p165_p8 = scmp.lt.s32.totalorder %s2922_s18, 3 }
   0xc   : > { %p166_p9 = pnand %p2608_p7, %p165_p8 }
   0xd   : > { %p191_p10 = scmp.lt.s32.totalorder (!%p166_p9), %s2979_s19, 1  ;;  %s2924_s6 = smov (!%p166_p9), 17  }
   0xe   : > { %169 = sbr.rel (%p166_p9) target bundleno = 1234 (0x4d2), region = 36  ;;  %s2925_s9 = smov (!%p166_p9), 16  }
   0xf   : > { %s2926_s10 = smov (!%p166_p9), 15   ;;  %s2927_s11 = smov (!%p166_p9), 1  }
  0x10   : > { %s2928_s12 = smov (!%p166_p9), 127   ;;  %s2929_s13 = smov (!%p166_p9), 113  }
  0x11   : > { %s2930_s14 = smov (!%p166_p9), 112   ;;  %s2931_s20 = smov (!%p166_p9), 111  }
  0x13   : > { %s192_s27 = scalar_select %p191_p10, %s2979_s19, 1  ;;  %v2634_v3 = vld [vmem:[%s3679_s3 + $0x8] sm:$0x3]  ;;  %vm248_vm0 = vcmask 1043456   ;;  %v207_v25 = vlaneseq  ;;  %v212_v29 = vld [vmem:[%s3679_s3] sm:$0x3] }
  0x14   : > { %v3017_v6 = vperm.slane %v2634_v3, 1  ;;  %v3019_v7 = vperm.slane %v2634_v3, 0  ;;  %v3047_v30 = vperm.slane %v212_v29, 1  ;;  %v3049_v31 = vperm.slane %v212_v29, 0  ;;  %v220_v37 = vld [vmem:[%s3677_s1] sm:$0xf] }
  0x15   : > { %s2807_s28 = sshll.u32 %s192_s27, 3  ;;  %v3041_v27 = vand.u32 127, %v207_v25  ;;  %vm244_vm2 = vcmask 31744   ;;  %v2612_v39 = vld [vmem:[%s3679_s3 + $0x2] sm:$0x3] }
  0x16   : > { %s195_s5 = scalar_lea.vmem %s3676_s0, %s2807_s28  ;;  %v499_v8 = vrot.slane %v3017_v6, 4  ;;  %v2622_v40 = vld [vmem:[%s3679_s3 + $0x4] sm:$0x3]  ;;  %v3072_v42 = vperm.slane %v2612_v39, 1  ;;  %v3074_v43 = vperm.slane %v2612_v39, 0  ;;  %s2880_s28 = scalar_lea.hbm %s3680_s4, 16 }
  0x17   : > { %v196_v0 = vld [vmem:[%s195_s5] sm:$0xff]  ;;  %vm209_vm1 = vcmp.lt.s32.totalorder %v3041_v27, 17  ;;  %vm353_vm3 = vcmp.lt.s32.totalorder %v3041_v27, 15  ;;  %vm230_vm4 = vcmp.lt.s32.totalorder %v3041_v27, 16  ;;  %v3076_v44 = vperm.slane %v2622_v40, 0 }
  0x18   : > { %198 = vst [vmem:[#allocation1] ss:$2 sm:$0xff] %v196_v0  ;;  %v500_v11 = vsel %vm248_vm0, %v3019_v7, %v499_v8  ;;  %v3078_v45 = vperm.slane %v2622_v40, 1  ;;  %v2613_v52 = vld [vmem:[%s3677_s1 + $0x4] sm:$0xf]  ;;  %vm427_vm5 = vcmp.lt.s32.totalorder %v3041_v27, 1 }
  0x19   : > { %v502_v12 = vmul.f32 %v500_v11, %v196_v0  ;;  %v2628_v56 = vld [vmem:[%s3679_s3 + $0x6] sm:$0x3]  ;;  %v2635_v3 = vld [vmem:[%s3677_s1 + $0x10] sm:$0xf]  ;;  %v854_v8 = vld [vmem:[%s3678_s2] sm:$0xf] }
  0x1a   : > { %v3103_v57 = vperm.slane %v2628_v56, 0  ;;  %v3105_v58 = vperm.slane %v2628_v56, 1  ;;  %vm567_vm6 = vcmp.lt.s32.totalorder %v3041_v27, 127  ;;  %v2932_v11 = vmov 0   ;;  %v2652_v29 = vld [vmem:[%s3679_s3 + $0xe] sm:$0x3] }
  0x1b   : > { %2857 = vset.pattern.permute.xlu1 %v2932_v11  ;;  %2858 = vset.pattern.permute.xlu0 %v2932_v11  ;;  %vm641_vm7 = vcmp.lt.s32.totalorder %v3041_v27, 113  ;;  %vm715_vm8 = vcmp.lt.s32.totalorder %v3041_v27, 112  ;;  %v2653_v40 = vld [vmem:[%s3677_s1 + $0x1c] sm:$0xf]  ;;  %vm789_vm9 = vcmp.lt.s32.totalorder %v3041_v27, 111 }
  0x1c   : > { %2859 = vset.pattern.permute.xlu2 %v2932_v11 }
  0x1f   : > { %v199_v1 = vld.sshfl [vmem:[#allocation1] sm:$0xff pattern:$0x75316420]  ;;  %v200_v2 = vld.sshfl [vmem:[#allocation1 + $0x8] sm:$0xff pattern:$0x75316420] }
  0x20   : > { %203 = vrot.lane.b32.xlu0 %v199_v1, %s2924_s6  ;;  %221 = vst [vmem:[#allocation1] ss:$2 sm:$0xff] %v196_v0  ;;  %v2623_v1 = vld [vmem:[%s3677_s1 + $0x8] sm:$0xf] }
  0x27   : > { %v222_v4 = vld.sshfl [vmem:[#allocation1] sm:$0xff pattern:$0x75316420]  ;;  %v223_v5 = vld.sshfl [vmem:[#allocation1 + $0x8] sm:$0xff pattern:$0x75316420] }
  0x28   : > { %226 = vrot.lane.b32.xlu1 %v222_v4, %s2925_s9  ;;  %205 = vrot.lane.b32.xlu0 %v200_v2, %s2924_s6  ;;  %344 = vst [vmem:[#allocation1] ss:$2 sm:$0xff] %v196_v0  ;;  %v2629_v2 = vld [vmem:[%s3677_s1 + $0xc] sm:$0xf]  ;;  %v2640_v4 = vld [vmem:[%s3679_s3 + $0xa] sm:$0x3] }
  0x2f   : > { %v345_v9 = vld.sshfl [vmem:[#allocation1] sm:$0xff pattern:$0x75316420]  ;;  %v346_v10 = vld.sshfl [vmem:[#allocation1 + $0x8] sm:$0xff pattern:$0x75316420] }
  0x30   : > { %228 = vrot.lane.b32.xlu1 %v223_v5, %s2925_s9  ;;  %418 = vst [vmem:[#allocation1] ss:$2 sm:$0xff] %v196_v0  ;;  %349 = vrot.lane.b32.xlu2 %v345_v9, %s2926_s10  ;;  %v3142_v9 = vperm.slane %v2640_v4, 0 }
  0x37   : > { %v420_v13 = vld.sshfl [vmem:[#allocation1 + $0x8] sm:$0xff pattern:$0x75316420]  ;;  %v419_v14 = vld.sshfl [vmem:[#allocation1] sm:$0xff pattern:$0x75316420] }
  0x38   : > { %425 = vrot.lane.b32.xlu1 %v420_v13, %s2927_s11  ;;  %423 = vrot.lane.b32.xlu0 %v419_v14, %s2927_s11  ;;  %506 = vst [vmem:[#allocation1] ss:$2 sm:$0xff] %v502_v12 }
  0x39   : > { %351 = vrot.lane.b32.xlu2 %v346_v10, %s2926_s10  ;;  %v3144_v10 = vperm.slane %v2640_v4, 1 }
  0x3f   : > { %v3029_v15 = vld.sshfl [vmem:[#allocation1] sm:$0xff pattern:$0x75316420]  ;;  %v3031_v16 = vld.sshfl [vmem:[#allocation1 + $0x8] sm:$0xff pattern:$0x75316420] }
  0x40   : > { %558 = vst [vmem:[#allocation1] ss:$2 sm:$0xff] %v196_v0 }
  0x47   : > { %v560_v17 = vld.sshfl [vmem:[#allocation1 + $0x8] sm:$0xff pattern:$0x75316420]  ;;  %v559_v18 = vld.sshfl [vmem:[#allocation1] sm:$0xff pattern:$0x75316420] }
  0x48   : > { %565 = vrot.lane.b32.xlu0 %v560_v17, %s2928_s12  ;;  %632 = vst [vmem:[#allocation1] ss:$2 sm:$0xff] %v196_v0  ;;  %563 = vrot.lane.b32.xlu2 %v559_v18, %s2928_s12  ;;  %v2641_v17 = vld [vmem:[%s3677_s1 + $0x14] sm:$0xf]  ;;  %v2646_v18 = vld [vmem:[%s3679_s3 + $0xc] sm:$0x3] }
  0x4f   : > { %v633_v19 = vld.sshfl [vmem:[#allocation1] sm:$0xff pattern:$0x75316420]  ;;  %v634_v20 = vld.sshfl [vmem:[#allocation1 + $0x8] sm:$0xff pattern:$0x75316420] }
  0x50   : > { %637 = vrot.lane.b32.xlu1 %v633_v19, %s2929_s13  ;;  %706 = vst [vmem:[#allocation1] ss:$2 sm:$0xff] %v196_v0  ;;  %639 = vrot.lane.b32.xlu2 %v634_v20, %s2929_s13  ;;  %v3164_v20 = vperm.slane %v2646_v18, 0 }
  0x57   : > { %v708_v21 = vld.sshfl [vmem:[#allocation1 + $0x8] sm:$0xff pattern:$0x75316420]  ;;  %v707_v22 = vld.sshfl [vmem:[#allocation1] sm:$0xff pattern:$0x75316420] }
  0x58   : > { %713 = vrot.lane.b32.xlu1 %v708_v21, %s2930_s14  ;;  %711 = vrot.lane.b32.xlu0 %v707_v22, %s2930_s14  ;;  %780 = vst [vmem:[#allocation1] ss:$2 sm:$0xff] %v196_v0  ;;  %v3166_v21 = vperm.slane %v2646_v18, 1 }
  0x5f   : > { %v782_v23 = vld.sshfl [vmem:[#allocation1 + $0x8] sm:$0xff pattern:$0x75316420]  ;;  %v781_v24 = vld.sshfl [vmem:[#allocation1] sm:$0xff pattern:$0x75316420] }
  0x60   : > { %787 = vrot.lane.b32.xlu0 %v782_v23, %s2931_s20  ;;  %785 = vrot.lane.b32.xlu2 %v781_v24, %s2931_s20  ;;  %1412 = vst [vmem:[#allocation1] ss:$2 sm:$0xff] %v196_v0 }
  0x61   : > { %857 = vperm.xlu1 %2857, %v854_v8  }
  0x8a   : > { %v350_v28 = vpop.permute.xlu2 %349 }
  0x92   : > { %v204_v26 = vpop.permute.xlu0 %203 }
  0x93   : > { %v352_v41 = vpop.permute.xlu2 %351 }
  0x94   : > { %v354_v46 = vsel %vm353_vm3, %v350_v28, %v352_v41  ;;  %v355_v47 = vsel %vm353_vm3, %v352_v41, %v350_v28  ;;  %v2647_v28 = vld [vmem:[%s3677_s1 + $0x18] sm:$0xf]  ;;  %v2658_v41 = vld [vmem:[%s3679_s3 + $0x10] sm:$0x3] }
  0x95   : > { %v363_v54 = vmul.f32 %v3076_v44, %v355_v47  ;;  %v364_v55 = vmul.f32 %v3078_v45, %v354_v46  ;;  %v3206_v46 = vperm.slane %v2658_v41, 0  ;;  %v3208_v47 = vperm.slane %v2658_v41, 1 }
  0x9a   : > { %v227_v32 = vpop.permute.xlu1 %226  ;;  %v206_v33 = vpop.permute.xlu0 %205 }
  0x9b   : > { %v210_v34 = vsel %vm209_vm1, %v204_v26, %v206_v33  ;;  %v211_v35 = vsel %vm209_vm1, %v206_v33, %v204_v26  ;;  %v3187_v33 = vperm.slane %v2652_v29, 1 }
  0x9c   : > { %v219_v36 = vmul.f32 %v3047_v30, %v210_v34  ;;  %v218_v38 = vmul.f32 %v3049_v31, %v211_v35 }
  0x9e   : > { %2620 = vmatpush.msk.msra.mxu3 %vm248_vm0, %v219_v36  ;;  %2618 = vmatpush.msk.msra.mxu2 %vm248_vm0, %v218_v38 }
  0x9f   : > { %2621 = vmatmul.msk.f32.vlgmr.msra.gmra.mxu3 %vm244_vm2, %v220_v37  ;;  %2619 = vmatmul.msk.f32.vlgmr.msra.gmra.mxu2 %vm244_vm2, %v220_v37 }
  0xa2   : > { %v229_v48 = vpop.permute.xlu1 %228  ;;  %v564_v5 = vpop.permute.xlu2 %563 }
  0xa3   : > { %v231_v49 = vsel %vm230_vm4, %v227_v32, %v229_v48  ;;  %v232_v50 = vsel %vm230_vm4, %v229_v48, %v227_v32  ;;  %v3185_v32 = vperm.slane %v2652_v29, 0 }
  0xa4   : > { %v241_v51 = vmul.f32 %v3072_v42, %v231_v49  ;;  %v240_v53 = vmul.f32 %v3074_v43, %v232_v50 }
  0xa6   : > { %2616 = vmatpush.msk.msra.mxu1 %vm248_vm0, %v241_v51  ;;  %2614 = vmatpush.msk.msra.mxu0 %vm248_vm0, %v240_v53 }
  0xa7   : > { %2617 = vmatmul.msk.f32.vlgmr.msra.gmra.mxu1 %vm244_vm2, %v2613_v52  ;;  %2615 = vmatmul.msk.f32.vlgmr.msra.gmra.mxu0 %vm244_vm2, %v2613_v52 }
  0xa8   : > { %2626 = vmatpush.msk.msrb.mxu1 %vm248_vm0, %v364_v55  ;;  %2624 = vmatpush.msk.msrb.mxu0 %vm248_vm0, %v363_v54  ;;  %v2659_v54 = vld [vmem:[%s3677_s1 + $0x20] sm:$0xf] }
  0xaa   : > { %2638 = vmatpush.msk.msra.mxu1 %vm248_vm0, %v3031_v16  ;;  %2636 = vmatpush.msk.msra.mxu0 %vm248_vm0, %v3029_v15  ;;  %v426_v59 = vpop.permute.xlu1 %425  ;;  %v424_v60 = vpop.permute.xlu0 %423 }
  0xab   : > { %v428_v61 = vsel %vm427_vm5, %v424_v60, %v426_v59  ;;  %v429_v62 = vsel %vm427_vm5, %v426_v59, %v424_v60  ;;  %v640_v19 = vpop.permute.xlu2 %639 }
  0xac   : > { %v437_v63 = vmul.f32 %v3103_v57, %v429_v62  ;;  %v438_v0 = vmul.f32 %v3105_v58, %v428_v61 }
  0xae   : > { %2632 = vmatpush.msk.msrb.mxu3 %vm248_vm0, %v438_v0  ;;  %2630 = vmatpush.msk.msrb.mxu2 %vm248_vm0, %v437_v63 }
  0xaf   : > { %2627 = vmatmul.msk.f32.vlgmr.msrb.gmra.mxu1 %vm244_vm2, %v2623_v1  ;;  %2633 = vmatmul.msk.f32.vlgmr.msrb.gmra.mxu3 %vm244_vm2, %v2629_v2 }
  0xb0   : > { %2625 = vmatmul.msk.f32.vlgmr.msrb.gmra.mxu0 %vm244_vm2, %v2623_v1  ;;  %2631 = vmatmul.msk.f32.vlgmr.msrb.gmra.mxu2 %vm244_vm2, %v2629_v2 }
  0xb7   : > { %2639 = vmatmul.msk.f32.vlgmr.msra.gmra.mxu1 %vm244_vm2, %v2635_v3 }
  0xb8   : > { %2637 = vmatmul.msk.f32.vlgmr.msra.gmra.mxu0 %vm244_vm2, %v2635_v3 }
  0xba   : > { %v566_v12 = vpop.permute.xlu0 %565  ;;  %v786_v48 = vpop.permute.xlu2 %785 }
  0xbb   : > { %v568_v13 = vsel %vm567_vm6, %v564_v5, %v566_v12  ;;  %v569_v14 = vsel %vm567_vm6, %v566_v12, %v564_v5 }
  0xbc   : > { %v577_v15 = vmul.f32 %v3142_v9, %v568_v13  ;;  %v578_v16 = vmul.f32 %v3144_v10, %v569_v14 }
  0xbe   : > { %2642 = vmatpush.msk.msra.mxu2 %vm248_vm0, %v577_v15  ;;  %2644 = vmatpush.msk.msra.mxu3 %vm248_vm0, %v578_v16 }
  0xbf   : > { %2643 = vmatmul.msk.f32.vlgmr.msra.gmra.mxu2 %vm244_vm2, %v2641_v17  ;;  %2645 = vmatmul.msk.f32.vlgmr.msra.gmra.mxu3 %vm244_vm2, %v2641_v17 }
  0xc2   : > { %v638_v22 = vpop.permute.xlu1 %637 }
  0xc3   : > { %v642_v23 = vsel %vm641_vm7, %v638_v22, %v640_v19  ;;  %v643_v24 = vsel %vm641_vm7, %v640_v19, %v638_v22 }
  0xc4   : > { %v651_v25 = vmul.f32 %v3164_v20, %v642_v23  ;;  %v652_v26 = vmul.f32 %v3166_v21, %v643_v24 }
  0xc6   : > { %2648 = vmatpush.msk.msrb.mxu0 %vm248_vm0, %v651_v25  ;;  %2650 = vmatpush.msk.msrb.mxu1 %vm248_vm0, %v652_v26 }
  0xc7   : > { %2649 = vmatmul.msk.f32.vlgmr.msrb.gmra.mxu0 %vm244_vm2, %v2647_v28  ;;  %2651 = vmatmul.msk.f32.vlgmr.msrb.gmra.mxu1 %vm244_vm2, %v2647_v28 }
  0xca   : > { %v714_v34 = vpop.permute.xlu1 %713  ;;  %v712_v35 = vpop.permute.xlu0 %711 }
  0xcb   : > { %v716_v36 = vsel %vm715_vm8, %v712_v35, %v714_v34  ;;  %v717_v37 = vsel %vm715_vm8, %v714_v34, %v712_v35 }
  0xcc   : > { %v725_v38 = vmul.f32 %v3185_v32, %v716_v36  ;;  %v726_v39 = vmul.f32 %v3187_v33, %v717_v37 }
  0xce   : > { %2654 = vmatpush.msk.msrb.mxu2 %vm248_vm0, %v725_v38  ;;  %2656 = vmatpush.msk.msrb.mxu3 %vm248_vm0, %v726_v39 }
  0xcf   : > { %2655 = vmatmul.msk.f32.vlgmr.msrb.gmra.mxu2 %vm244_vm2, %v2653_v40  ;;  %2657 = vmatmul.msk.f32.vlgmr.msrb.gmra.mxu3 %vm244_vm2, %v2653_v40 }
  0xd2   : > { %v788_v49 = vpop.permute.xlu0 %787 }
  0xd3   : > { %v790_v50 = vsel %vm789_vm9, %v786_v48, %v788_v49  ;;  %v791_v51 = vsel %vm789_vm9, %v788_v49, %v786_v48  ;;  %v858_v34 = vpop.permute.xlu1 %857 }
  0xd4   : > { %v799_v52 = vmul.f32 %v3206_v46, %v790_v50  ;;  %v800_v53 = vmul.f32 %v3208_v47, %v791_v51 }
  0xd6   : > { %2660 = vmatpush.msk.msra.mxu0 %vm248_vm0, %v799_v52  ;;  %2662 = vmatpush.msk.msra.mxu1 %vm248_vm0, %v800_v53 }
  0xd7   : > { %2661 = vmatmul.msk.f32.vlgmr.msra.gmra.mxu0 %vm244_vm2, %v2659_v54  ;;  %2663 = vmatmul.msk.f32.vlgmr.msra.gmra.mxu1 %vm244_vm2, %v2659_v54 }
 0x122   : > { %v321_v59 = vpop.f32.mrf.mxu2  ;;  %v341_v60 = vpop.f32.mrf.mxu3 }
 0x124   : > { %v272_v55 = vpop.f32.mrf.mxu0  ;;  %v292_v56 = vpop.f32.mrf.mxu1 }
 0x125   : > { %v342_v63 = vadd.f32 %v341_v60, %v292_v56  ;;  %v322_v0 = vadd.f32 %v321_v59, %v272_v55 }
 0x12c   : > { %v413_v62 = vpop.f32.mrf.mxu1 }
 0x12d   : > { %v393_v61 = vpop.f32.mrf.mxu0  ;;  %v417_v4 = vadd.f32 %v413_v62, %v342_v63 }
 0x12e   : > { %v416_v5 = vadd.f32 %v393_v61, %v322_v0  ;;  %v2665_v0 = vld [vmem:[%s3677_s1 + $0x28] sm:$0xf] }
 0x132   : > { %v487_v2 = vpop.f32.mrf.mxu3 }
 0x133   : > { %v467_v1 = vpop.f32.mrf.mxu2  ;;  %v491_v11 = vadd.f32 %v487_v2, %v417_v4 }
 0x134   : > { %v553_v8 = vpop.f32.mrf.mxu1  ;;  %v490_v12 = vadd.f32 %v467_v1, %v416_v5 }
 0x135   : > { %v533_v3 = vpop.f32.mrf.mxu0  ;;  %v557_v15 = vadd.f32 %v553_v8, %v491_v11 }
 0x136   : > { %v556_v16 = vadd.f32 %v533_v3, %v490_v12  ;;  %v2709_v3 = vld [vmem:[%s3678_s2 + $0x4] sm:$0xf] }
 0x142   : > { %v607_v13 = vpop.f32.mrf.mxu2  ;;  %v627_v14 = vpop.f32.mrf.mxu3 }
 0x143   : > { %v630_v19 = vadd.f32 %v607_v13, %v556_v16  ;;  %v631_v22 = vadd.f32 %v627_v14, %v557_v15  ;;  %v2664_v14 = vld [vmem:[%s3677_s1 + $0x24] sm:$0xf]  ;;  %v2674_v15 = vld [vmem:[%s3677_s1 + $0x2c] sm:$0xf] }
 0x144   : > { %v681_v17 = vpop.f32.mrf.mxu0  ;;  %v701_v18 = vpop.f32.mrf.mxu1 }
 0x145   : > { %v704_v23 = vadd.f32 %v681_v17, %v630_v19  ;;  %v705_v24 = vadd.f32 %v701_v18, %v631_v22 }
 0x152   : > { %v755_v25 = vpop.f32.mrf.mxu2  ;;  %v775_v26 = vpop.f32.mrf.mxu3 }
 0x153   : > { %v778_v28 = vadd.f32 %v755_v25, %v704_v23  ;;  %v779_v29 = vadd.f32 %v775_v26, %v705_v24 }
 0x154   : > { %v829_v35 = vpop.f32.mrf.mxu0  ;;  %v849_v36 = vpop.f32.mrf.mxu1 }
 0x155   : > { %v852_v37 = vadd.f32 %v829_v35, %v778_v28  ;;  %v853_v38 = vadd.f32 %v849_v36, %v779_v29  ;;  %v2684_v35 = vld [vmem:[%s3677_s1 + $0x34] sm:$0xf] }
 0x157   : > { %v860_v39 = vadd.f32 %v858_v34, %v852_v37  ;;  %v861_v40 = vadd.f32 %v858_v34, %v853_v38  ;;  %v2679_v34 = vld [vmem:[%s3677_s1 + $0x30] sm:$0xf] }
 0x159   : > { %v862_v41 = vmax.f32 %v860_v39, 0.0  ;;  %v863_v48 = vmax.f32 %v861_v40, 0.0 }
 0x15b   : > { %876 = vrot.lane.b32.xlu0 %v863_v48, %s2925_s9  ;;  %982 = vrot.lane.b32.xlu1 %v862_v41, %s2926_s10  ;;  %v1104_v1 = vmul.f32 %v862_v41, %v3019_v7  ;;  %v1105_v2 = vmul.f32 %v863_v48, %v3017_v6 }
 0x15c   : > { %874 = vrot.lane.b32.xlu2 %v862_v41, %s2925_s9 }
 0x163   : > { %864 = vrot.lane.b32.xlu0 %v862_v41, %s2924_s6  ;;  %866 = vrot.lane.b32.xlu1 %v863_v48, %s2924_s6 }
 0x164   : > { %984 = vrot.lane.b32.xlu2 %v863_v48, %s2926_s10 }
 0x16b   : > { %1045 = vrot.lane.b32.xlu0 %v863_v48, %s2927_s11  ;;  %1220 = vrot.lane.b32.xlu1 %v862_v41, %s2929_s13 }
 0x16c   : > { %1043 = vrot.lane.b32.xlu2 %v862_v41, %s2927_s11 }
 0x173   : > { %1159 = vrot.lane.b32.xlu0 %v862_v41, %s2928_s12  ;;  %1161 = vrot.lane.b32.xlu1 %v863_v48, %s2928_s12 }
 0x174   : > { %1222 = vrot.lane.b32.xlu2 %v863_v48, %s2929_s13 }
 0x17b   : > { %1344 = vrot.lane.b32.xlu0 %v863_v48, %s2931_s20  ;;  %1281 = vrot.lane.b32.xlu1 %v862_v41, %s2930_s14 }
 0x17c   : > { %1342 = vrot.lane.b32.xlu2 %v862_v41, %s2931_s20 }
 0x183   : > { %1407 = vperm.xlu0 %2858, %v2709_v3  }
 0x184   : > { %1283 = vrot.lane.b32.xlu2 %v863_v48, %s2930_s14 }
 0x1b6   : > { %v875_v49 = vpop.permute.xlu2 %874 }
 0x1be   : > { %v985_v50 = vpop.permute.xlu2 %984 }
 0x1c6   : > { %v1044_v53 = vpop.permute.xlu2 %1043 }
 0x1cd   : > { %v877_v51 = vpop.permute.xlu0 %876  ;;  %v983_v52 = vpop.permute.xlu1 %982 }
 0x1ce   : > { %v878_v54 = vsel %vm230_vm4, %v875_v49, %v877_v51  ;;  %v879_v55 = vsel %vm230_vm4, %v877_v51, %v875_v49  ;;  %v986_v56 = vsel %vm353_vm3, %v983_v52, %v985_v50  ;;  %v987_v59 = vsel %vm353_vm3, %v985_v50, %v983_v52  ;;  %v1223_v16 = vpop.permute.xlu2 %1222  ;;  %v2689_v49 = vld [vmem:[%s3677_s1 + $0x38] sm:$0xf]  ;;  %v2694_v50 = vld [vmem:[%s3677_s1 + $0x3c] sm:$0xf] }
 0x1cf   : > { %v880_v60 = vmul.f32 %v879_v55, %v3074_v43  ;;  %v881_v61 = vmul.f32 %v878_v54, %v3072_v42  ;;  %v988_v62 = vmul.f32 %v987_v59, %v3076_v44  ;;  %v989_v63 = vmul.f32 %v986_v56, %v3078_v45 }
 0x1d1   : > { %2666 = vmatpush.msk.msra.mxu2 %vm248_vm0, %v880_v60  ;;  %2668 = vmatpush.msk.msra.mxu3 %vm248_vm0, %v881_v61 }
 0x1d2   : > { %2667 = vmatmul.msk.f32.vlgmr.msra.gmra.mxu2 %vm244_vm2, %v2665_v0  ;;  %2669 = vmatmul.msk.f32.vlgmr.msra.gmra.mxu3 %vm244_vm2, %v2665_v0  ;;  %v2699_v0 = vld [vmem:[%s3677_s1 + $0x40] sm:$0xf] }
 0x1d3   : > { %2675 = vmatpush.msk.msrb.mxu2 %vm248_vm0, %v988_v62  ;;  %2677 = vmatpush.msk.msrb.mxu3 %vm248_vm0, %v989_v63 }
 0x1d5   : > { %2685 = vmatpush.msk.msra.mxu2 %vm248_vm0, %v1104_v1  ;;  %2687 = vmatpush.msk.msra.mxu3 %vm248_vm0, %v1105_v2  ;;  %v865_v4 = vpop.permute.xlu0 %864  ;;  %v867_v5 = vpop.permute.xlu1 %866  ;;  %v2704_v1 = vld [vmem:[%s3677_s1 + $0x44] sm:$0xf] }
 0x1d6   : > { %v868_v8 = vsel %vm209_vm1, %v865_v4, %v867_v5  ;;  %v869_v11 = vsel %vm209_vm1, %v867_v5, %v865_v4  ;;  %v1343_v36 = vpop.permute.xlu2 %1342 }
 0x1d7   : > { %v870_v12 = vmul.f32 %v869_v11, %v3049_v31  ;;  %v871_v13 = vmul.f32 %v868_v8, %v3047_v30 }
 0x1d9   : > { %2670 = vmatpush.msk.msrb.mxu0 %vm248_vm0, %v870_v12  ;;  %2672 = vmatpush.msk.msrb.mxu1 %vm248_vm0, %v871_v13 }
 0x1da   : > { %2671 = vmatmul.msk.f32.vlgmr.msrb.gmra.mxu0 %vm244_vm2, %v2664_v14  ;;  %2676 = vmatmul.msk.f32.vlgmr.msrb.gmra.mxu2 %vm244_vm2, %v2674_v15 }
 0x1db   : > { %2678 = vmatmul.msk.f32.vlgmr.msrb.gmra.mxu3 %vm244_vm2, %v2674_v15  ;;  %2673 = vmatmul.msk.f32.vlgmr.msrb.gmra.mxu1 %vm244_vm2, %v2664_v14 }
 0x1dd   : > { %v1046_v17 = vpop.permute.xlu0 %1045  ;;  %v1221_v18 = vpop.permute.xlu1 %1220 }
 0x1de   : > { %v1047_v19 = vsel %vm427_vm5, %v1044_v53, %v1046_v17  ;;  %v1048_v22 = vsel %vm427_vm5, %v1046_v17, %v1044_v53  ;;  %v1224_v23 = vsel %vm641_vm7, %v1221_v18, %v1223_v16  ;;  %v1225_v24 = vsel %vm641_vm7, %v1223_v16, %v1221_v18  ;;  %v1284_v51 = vpop.permute.xlu2 %1283 }
 0x1df   : > { %v1049_v25 = vmul.f32 %v1048_v22, %v3103_v57  ;;  %v1050_v26 = vmul.f32 %v1047_v19, %v3105_v58  ;;  %v1226_v28 = vmul.f32 %v1224_v23, %v3164_v20  ;;  %v1227_v29 = vmul.f32 %v1225_v24, %v3166_v21 }
 0x1e1   : > { %2680 = vmatpush.msk.msra.mxu0 %vm248_vm0, %v1049_v25  ;;  %2682 = vmatpush.msk.msra.mxu1 %vm248_vm0, %v1050_v26 }
 0x1e2   : > { %2695 = vmatpush.msk.msrb.mxu2 %vm248_vm0, %v1226_v28  ;;  %2697 = vmatpush.msk.msrb.mxu3 %vm248_vm0, %v1227_v29 }
 0x1e3   : > { %2681 = vmatmul.msk.f32.vlgmr.msra.gmra.mxu0 %vm244_vm2, %v2679_v34  ;;  %2686 = vmatmul.msk.f32.vlgmr.msra.gmra.mxu2 %vm244_vm2, %v2684_v35 }
 0x1e4   : > { %2688 = vmatmul.msk.f32.vlgmr.msra.gmra.mxu3 %vm244_vm2, %v2684_v35  ;;  %2683 = vmatmul.msk.f32.vlgmr.msra.gmra.mxu1 %vm244_vm2, %v2679_v34 }
 0x1e5   : > { %v1160_v37 = vpop.permute.xlu0 %1159  ;;  %v1162_v38 = vpop.permute.xlu1 %1161 }
 0x1e6   : > { %v1163_v39 = vsel %vm567_vm6, %v1160_v37, %v1162_v38  ;;  %v1164_v40 = vsel %vm567_vm6, %v1162_v38, %v1160_v37 }
 0x1e7   : > { %v1165_v41 = vmul.f32 %v1163_v39, %v3142_v9  ;;  %v1166_v48 = vmul.f32 %v1164_v40, %v3144_v10 }
 0x1e9   : > { %2690 = vmatpush.msk.msrb.mxu0 %vm248_vm0, %v1165_v41  ;;  %2692 = vmatpush.msk.msrb.mxu1 %vm248_vm0, %v1166_v48 }
 0x1eb   : > { %2691 = vmatmul.msk.f32.vlgmr.msrb.gmra.mxu0 %vm244_vm2, %v2689_v49  ;;  %2696 = vmatmul.msk.f32.vlgmr.msrb.gmra.mxu2 %vm244_vm2, %v2694_v50 }
 0x1ec   : > { %2698 = vmatmul.msk.f32.vlgmr.msrb.gmra.mxu3 %vm244_vm2, %v2694_v50  ;;  %2693 = vmatmul.msk.f32.vlgmr.msrb.gmra.mxu1 %vm244_vm2, %v2689_v49 }
 0x1ed   : > { %v1345_v52 = vpop.permute.xlu0 %1344  ;;  %v1282_v53 = vpop.permute.xlu1 %1281 }
 0x1ee   : > { %v1346_v54 = vsel %vm789_vm9, %v1343_v36, %v1345_v52  ;;  %v1347_v55 = vsel %vm789_vm9, %v1345_v52, %v1343_v36  ;;  %v1285_v56 = vsel %vm715_vm8, %v1282_v53, %v1284_v51  ;;  %v1286_v59 = vsel %vm715_vm8, %v1284_v51, %v1282_v53 }
 0x1ef   : > { %v1348_v60 = vmul.f32 %v1346_v54, %v3206_v46  ;;  %v1349_v61 = vmul.f32 %v1347_v55, %v3208_v47  ;;  %v1287_v62 = vmul.f32 %v1285_v56, %v3185_v32  ;;  %v1288_v63 = vmul.f32 %v1286_v59, %v3187_v33  ;;  %v1413_v54 = vld.sshfl [vmem:[#allocation1] sm:$0xff pattern:$0x75316420]  ;;  %v1414_v55 = vld.sshfl [vmem:[#allocation1 + $0x8] sm:$0xff pattern:$0x75316420] }
 0x1f1   : > { %2700 = vmatpush.msk.msra.mxu0 %vm248_vm0, %v1287_v62  ;;  %2702 = vmatpush.msk.msra.mxu1 %vm248_vm0, %v1288_v63 }
 0x1f2   : > { %2705 = vmatpush.msk.msra.mxu2 %vm248_vm0, %v1348_v60  ;;  %2707 = vmatpush.msk.msra.mxu3 %vm248_vm0, %v1349_v61 }
 0x1f3   : > { %2701 = vmatmul.msk.f32.vlgmr.msra.gmra.mxu0 %vm244_vm2, %v2699_v0  ;;  %2706 = vmatmul.msk.f32.vlgmr.msra.gmra.mxu2 %vm244_vm2, %v2704_v1 }
 0x1f4   : > { %2708 = vmatmul.msk.f32.vlgmr.msra.gmra.mxu3 %vm244_vm2, %v2704_v1  ;;  %2703 = vmatmul.msk.f32.vlgmr.msra.gmra.mxu1 %vm244_vm2, %v2699_v0  ;;  %v2755_v0 = vld [vmem:[%s3678_s2 + $0x8] sm:$0xf] }
 0x1f5   : > { %v1408_v50 = vpop.permute.xlu0 %1407 }
 0x255   : > { %v910_v2 = vpop.f32.mrf.mxu2  ;;  %v930_v3 = vpop.f32.mrf.mxu3 }
 0x257   : > { %v959_v4 = vpop.f32.mrf.mxu0 }
 0x258   : > { %v979_v5 = vpop.f32.mrf.mxu1  ;;  %v960_v16 = vadd.f32 %v959_v4, %v910_v2 }
 0x259   : > { %v980_v11 = vadd.f32 %v979_v5, %v930_v3 }
 0x25d   : > { %v1018_v8 = vpop.f32.mrf.mxu2 }
 0x25e   : > { %v1038_v12 = vpop.f32.mrf.mxu3  ;;  %v1041_v17 = vadd.f32 %v1018_v8, %v960_v16 }
 0x25f   : > { %v1042_v15 = vadd.f32 %v1038_v12, %v980_v11 }
 0x260   : > { %v1079_v13 = vpop.f32.mrf.mxu0 }
 0x261   : > { %v1099_v14 = vpop.f32.mrf.mxu1  ;;  %v1102_v24 = vadd.f32 %v1079_v13, %v1041_v17  ;;  %v2710_v13 = vld [vmem:[%s3677_s1 + $0x48] sm:$0xf] }
 0x262   : > { %v1103_v18 = vadd.f32 %v1099_v14, %v1042_v15 }
 0x266   : > { %v1134_v19 = vpop.f32.mrf.mxu2 }
 0x267   : > { %v1154_v22 = vpop.f32.mrf.mxu3  ;;  %v1157_v28 = vadd.f32 %v1134_v19, %v1102_v24 }
 0x268   : > { %v1195_v23 = vpop.f32.mrf.mxu0  ;;  %v1158_v26 = vadd.f32 %v1154_v22, %v1103_v18 }
 0x269   : > { %v1215_v25 = vpop.f32.mrf.mxu1  ;;  %v1218_v35 = vadd.f32 %v1195_v23, %v1157_v28  ;;  %v2711_v28 = vld [vmem:[%s3677_s1 + $0x4c] sm:$0xf] }
 0x26a   : > { %v1219_v29 = vadd.f32 %v1215_v25, %v1158_v26 }
 0x26e   : > { %v1256_v34 = vpop.f32.mrf.mxu2 }
 0x26f   : > { %v1276_v36 = vpop.f32.mrf.mxu3  ;;  %v1279_v37 = vadd.f32 %v1256_v34, %v1218_v35 }
 0x270   : > { %v1280_v38 = vadd.f32 %v1276_v36, %v1219_v29  ;;  %v1317_v39 = vpop.f32.mrf.mxu0  ;;  %v2725_v29 = vld [vmem:[%s3677_s1 + $0x54] sm:$0xf] }
 0x271   : > { %v1337_v40 = vpop.f32.mrf.mxu1  ;;  %v1340_v41 = vadd.f32 %v1317_v39, %v1279_v37 }
 0x272   : > { %v1341_v48 = vadd.f32 %v1337_v40, %v1280_v38 }
 0x276   : > { %v1378_v49 = vpop.f32.mrf.mxu2 }
 0x277   : > { %v1401_v51 = vadd.f32 %v1378_v49, %v1340_v41  ;;  %v1398_v52 = vpop.f32.mrf.mxu3  ;;  %v2720_v41 = vld [vmem:[%s3677_s1 + $0x50] sm:$0xf] }
 0x278   : > { %v1402_v53 = vadd.f32 %v1398_v52, %v1341_v48 }
 0x279   : > { %v1410_v56 = vadd.f32 %v1408_v50, %v1401_v51 }
 0x27a   : > { %v1411_v59 = vadd.f32 %v1408_v50, %v1402_v53 }
 0x27b   : > { %v1417_v60 = vadd.f32 %v1413_v54, %v1410_v56 }
 0x27c   : > { %v1418_v61 = vadd.f32 %v1414_v55, %v1411_v59 }
 0x27d   : > { %v3355_v62 = vmax.f32 %v1417_v60, 0.0 }
 0x27e   : > { %v3357_v63 = vmax.f32 %v1418_v61, 0.0  ;;  %v2735_v61 = vld [vmem:[%s3677_s1 + $0x5c] sm:$0xf] }
 0x27f   : > { %1539 = vrot.lane.b32.xlu0 %v3355_v62, %s2926_s10  ;;  %1421 = vrot.lane.b32.xlu1 %v3355_v62, %s2924_s6  ;;  %v1661_v48 = vmul.f32 %v3355_v62, %v3019_v7 }
 0x280   : > { %1423 = vrot.lane.b32.xlu2 %v3357_v63, %s2924_s6  ;;  %v1662_v49 = vmul.f32 %v3357_v63, %v3017_v6 }
 0x287   : > { %1602 = vrot.lane.b32.xlu0 %v3357_v63, %s2927_s11  ;;  %1431 = vrot.lane.b32.xlu1 %v3355_v62, %s2925_s9 }
 0x288   : > { %1433 = vrot.lane.b32.xlu2 %v3357_v63, %s2925_s9 }
 0x28f   : > { %1777 = vrot.lane.b32.xlu0 %v3355_v62, %s2929_s13  ;;  %1541 = vrot.lane.b32.xlu1 %v3357_v63, %s2926_s10 }
 0x290   : > { %1600 = vrot.lane.b32.xlu2 %v3355_v62, %s2927_s11 }
 0x297   : > { %1840 = vrot.lane.b32.xlu0 %v3357_v63, %s2930_s14  ;;  %1716 = vrot.lane.b32.xlu1 %v3355_v62, %s2928_s12 }
 0x298   : > { %1718 = vrot.lane.b32.xlu2 %v3357_v63, %s2928_s12 }
 0x29f   : > { %1964 = vperm.xlu0 %2858, %v2755_v0   ;;  %1779 = vrot.lane.b32.xlu1 %v3357_v63, %s2929_s13 }
 0x2a0   : > { %1838 = vrot.lane.b32.xlu2 %v3355_v62, %s2930_s14 }
 0x2a7   : > { %1899 = vrot.lane.b32.xlu1 %v3355_v62, %s2931_s20 }
 0x2a8   : > { %1901 = vrot.lane.b32.xlu2 %v3357_v63, %s2931_s20 }
 0x2da   : > { %v1424_v1 = vpop.permute.xlu2 %1423 }
 0x2e2   : > { %v1434_v2 = vpop.permute.xlu2 %1433 }
 0x2ea   : > { %v1601_v14 = vpop.permute.xlu2 %1600 }
 0x2f1   : > { %v1540_v3 = vpop.permute.xlu0 %1539  ;;  %v1422_v4 = vpop.permute.xlu1 %1421 }
 0x2f2   : > { %v1425_v5 = vsel %vm209_vm1, %v1422_v4, %v1424_v1  ;;  %v1426_v8 = vsel %vm209_vm1, %v1424_v1, %v1422_v4  ;;  %v1719_v34 = vpop.permute.xlu2 %1718 }
 0x2f3   : > { %v1427_v11 = vmul.f32 %v1426_v8, %v3049_v31  ;;  %v1428_v12 = vmul.f32 %v1425_v5, %v3047_v30 }
 0x2f5   : > { %2716 = vmatpush.msk.msrb.mxu2 %vm248_vm0, %v1427_v11  ;;  %2718 = vmatpush.msk.msrb.mxu3 %vm248_vm0, %v1428_v12  ;;  %v2745_v12 = vld [vmem:[%s3677_s1 + $0x64] sm:$0xf] }
 0x2f6   : > { %2717 = vmatmul.msk.f32.vlgmr.msrb.gmra.mxu2 %vm244_vm2, %v2710_v13  ;;  %2719 = vmatmul.msk.f32.vlgmr.msrb.gmra.mxu3 %vm244_vm2, %v2710_v13  ;;  %v2740_v13 = vld [vmem:[%s3677_s1 + $0x60] sm:$0xf] }
 0x2f9   : > { %v1603_v15 = vpop.permute.xlu0 %1602  ;;  %v1432_v16 = vpop.permute.xlu1 %1431 }
 0x2fa   : > { %v1604_v17 = vsel %vm427_vm5, %v1601_v14, %v1603_v15  ;;  %v1605_v18 = vsel %vm427_vm5, %v1603_v15, %v1601_v14  ;;  %v1435_v19 = vsel %vm230_vm4, %v1432_v16, %v1434_v2  ;;  %v1436_v22 = vsel %vm230_vm4, %v1434_v2, %v1432_v16  ;;  %v1839_v50 = vpop.permute.xlu2 %1838  ;;  %v2730_v2 = vld [vmem:[%s3677_s1 + $0x58] sm:$0xf] }
 0x2fb   : > { %v1606_v23 = vmul.f32 %v1605_v18, %v3103_v57  ;;  %v1607_v24 = vmul.f32 %v1604_v17, %v3105_v58  ;;  %v1437_v25 = vmul.f32 %v1436_v22, %v3074_v43  ;;  %v1438_v26 = vmul.f32 %v1435_v19, %v3072_v42  ;;  %v2750_v22 = vld [vmem:[%s3677_s1 + $0x68] sm:$0xf] }
 0x2fd   : > { %2712 = vmatpush.msk.msrb.mxu0 %vm248_vm0, %v1437_v25  ;;  %2714 = vmatpush.msk.msrb.mxu1 %vm248_vm0, %v1438_v26 }
 0x2fe   : > { %2726 = vmatpush.msk.msra.mxu2 %vm248_vm0, %v1606_v23  ;;  %2728 = vmatpush.msk.msra.mxu3 %vm248_vm0, %v1607_v24 }
 0x2ff   : > { %2713 = vmatmul.msk.f32.vlgmr.msrb.gmra.mxu0 %vm244_vm2, %v2711_v28  ;;  %2715 = vmatmul.msk.f32.vlgmr.msrb.gmra.mxu1 %vm244_vm2, %v2711_v28 }
 0x300   : > { %2727 = vmatmul.msk.f32.vlgmr.msra.gmra.mxu2 %vm244_vm2, %v2725_v29  ;;  %2729 = vmatmul.msk.f32.vlgmr.msra.gmra.mxu3 %vm244_vm2, %v2725_v29 }
 0x301   : > { %v1778_v35 = vpop.permute.xlu0 %1777  ;;  %v1542_v36 = vpop.permute.xlu1 %1541 }
 0x302   : > { %v1543_v37 = vsel %vm353_vm3, %v1540_v3, %v1542_v36  ;;  %v1544_v38 = vsel %vm353_vm3, %v1542_v36, %v1540_v3  ;;  %v1902_v14 = vpop.permute.xlu2 %1901 }
 0x303   : > { %v1545_v39 = vmul.f32 %v1544_v38, %v3076_v44  ;;  %v1546_v40 = vmul.f32 %v1543_v37, %v3078_v45 }
 0x305   : > { %2721 = vmatpush.msk.msra.mxu0 %vm248_vm0, %v1545_v39  ;;  %2723 = vmatpush.msk.msra.mxu1 %vm248_vm0, %v1546_v40 }
 0x307   : > { %2731 = vmatpush.msk.msrb.mxu0 %vm248_vm0, %v1661_v48  ;;  %2733 = vmatpush.msk.msrb.mxu1 %vm248_vm0, %v1662_v49 }
 0x308   : > { %2722 = vmatmul.msk.f32.vlgmr.msra.gmra.mxu0 %vm244_vm2, %v2720_v41  ;;  %2724 = vmatmul.msk.f32.vlgmr.msra.gmra.mxu1 %vm244_vm2, %v2720_v41 }
 0x309   : > { %v1841_v51 = vpop.permute.xlu0 %1840  ;;  %v1717_v52 = vpop.permute.xlu1 %1716 }
 0x30a   : > { %v1842_v53 = vsel %vm715_vm8, %v1839_v50, %v1841_v51  ;;  %v1843_v54 = vsel %vm715_vm8, %v1841_v51, %v1839_v50  ;;  %v1720_v55 = vsel %vm567_vm6, %v1717_v52, %v1719_v34  ;;  %v1721_v56 = vsel %vm567_vm6, %v1719_v34, %v1717_v52 }
 0x30b   : > { %v1722_v59 = vmul.f32 %v1720_v55, %v3142_v9  ;;  %v1723_v60 = vmul.f32 %v1721_v56, %v3144_v10  ;;  %v1844_v0 = vmul.f32 %v1842_v53, %v3185_v32  ;;  %v1845_v1 = vmul.f32 %v1843_v54, %v3187_v33 }
 0x30d   : > { %2736 = vmatpush.msk.msrb.mxu2 %vm248_vm0, %v1722_v59  ;;  %2738 = vmatpush.msk.msrb.mxu3 %vm248_vm0, %v1723_v60 }
 0x30e   : > { %2737 = vmatmul.msk.f32.vlgmr.msrb.gmra.mxu2 %vm244_vm2, %v2735_v61  ;;  %2739 = vmatmul.msk.f32.vlgmr.msrb.gmra.mxu3 %vm244_vm2, %v2735_v61 }
 0x30f   : > { %2746 = vmatpush.msk.msra.mxu2 %vm248_vm0, %v1844_v0  ;;  %2748 = vmatpush.msk.msra.mxu3 %vm248_vm0, %v1845_v1 }
 0x310   : > { %2732 = vmatmul.msk.f32.vlgmr.msrb.gmra.mxu0 %vm244_vm2, %v2730_v2  ;;  %2734 = vmatmul.msk.f32.vlgmr.msrb.gmra.mxu1 %vm244_vm2, %v2730_v2 }
 0x311   : > { %v1780_v3 = vpop.permute.xlu1 %1779 }
 0x312   : > { %v1781_v4 = vsel %vm641_vm7, %v1778_v35, %v1780_v3  ;;  %v1782_v5 = vsel %vm641_vm7, %v1780_v3, %v1778_v35 }
 0x313   : > { %v1783_v8 = vmul.f32 %v1781_v4, %v3164_v20  ;;  %v1784_v11 = vmul.f32 %v1782_v5, %v3166_v21 }
 0x315   : > { %2741 = vmatpush.msk.msra.mxu0 %vm248_vm0, %v1783_v8  ;;  %2743 = vmatpush.msk.msra.mxu1 %vm248_vm0, %v1784_v11 }
 0x316   : > { %2747 = vmatmul.msk.f32.vlgmr.msra.gmra.mxu2 %vm244_vm2, %v2745_v12  ;;  %2749 = vmatmul.msk.f32.vlgmr.msra.gmra.mxu3 %vm244_vm2, %v2745_v12  ;;  %v1965_v12 = vpop.permute.xlu0 %1964 }
 0x318   : > { %2742 = vmatmul.msk.f32.vlgmr.msra.gmra.mxu0 %vm244_vm2, %v2740_v13  ;;  %2744 = vmatmul.msk.f32.vlgmr.msra.gmra.mxu1 %vm244_vm2, %v2740_v13 }
 0x319   : > { %v1900_v15 = vpop.permute.xlu1 %1899 }
 0x31a   : > { %v1903_v16 = vsel %vm789_vm9, %v1900_v15, %v1902_v14  ;;  %v1904_v17 = vsel %vm789_vm9, %v1902_v14, %v1900_v15 }
 0x31b   : > { %v1905_v18 = vmul.f32 %v1903_v16, %v3206_v46  ;;  %v1906_v19 = vmul.f32 %v1904_v17, %v3208_v47 }
 0x31d   : > { %2751 = vmatpush.msk.msrb.mxu0 %vm248_vm0, %v1905_v18  ;;  %2753 = vmatpush.msk.msrb.mxu1 %vm248_vm0, %v1906_v19 }
 0x320   : > { %2752 = vmatmul.msk.f32.vlgmr.msrb.gmra.mxu0 %vm244_vm2, %v2750_v22  ;;  %2754 = vmatmul.msk.f32.vlgmr.msrb.gmra.mxu1 %vm244_vm2, %v2750_v22 }
 0x379   : > { %v1536_v25 = vpop.f32.mrf.mxu3  ;;  %v1516_v26 = vpop.f32.mrf.mxu2 }
 0x37c   : > { %v1467_v23 = vpop.f32.mrf.mxu0  ;;  %v1487_v24 = vpop.f32.mrf.mxu1 }
 0x37d   : > { %v1537_v34 = vadd.f32 %v1536_v25, %v1487_v24  ;;  %v1517_v37 = vadd.f32 %v1516_v26, %v1467_v23 }
 0x383   : > { %v1636_v35 = vpop.f32.mrf.mxu2  ;;  %v1656_v36 = vpop.f32.mrf.mxu3 }
 0x385   : > { %v1575_v28 = vpop.f32.mrf.mxu0  ;;  %v1595_v29 = vpop.f32.mrf.mxu1 }
 0x386   : > { %v1598_v38 = vadd.f32 %v1575_v28, %v1517_v37  ;;  %v1599_v39 = vadd.f32 %v1595_v29, %v1537_v34  ;;  %v2757_v28 = vld [vmem:[%s3677_s1 + $0x70] sm:$0xf] }
 0x388   : > { %v1659_v48 = vadd.f32 %v1636_v35, %v1598_v38  ;;  %v1660_v49 = vadd.f32 %v1656_v36, %v1599_v39 }
 0x38d   : > { %v1691_v40 = vpop.f32.mrf.mxu0  ;;  %v1711_v41 = vpop.f32.mrf.mxu1 }
 0x38e   : > { %v1714_v52 = vadd.f32 %v1691_v40, %v1659_v48  ;;  %v1715_v53 = vadd.f32 %v1711_v41, %v1660_v49  ;;  %v2766_v41 = vld [vmem:[%s3677_s1 + $0x74] sm:$0xf] }
 0x391   : > { %v1752_v50 = vpop.f32.mrf.mxu2  ;;  %v1772_v51 = vpop.f32.mrf.mxu3 }
 0x392   : > { %v1775_v54 = vadd.f32 %v1752_v50, %v1714_v52  ;;  %v1776_v55 = vadd.f32 %v1772_v51, %v1715_v53  ;;  %v2776_v53 = vld [vmem:[%s3677_s1 + $0x7c] sm:$0xf] }
 0x395   : > { %v1813_v56 = vpop.f32.mrf.mxu0  ;;  %v1833_v59 = vpop.f32.mrf.mxu1 }
 0x396   : > { %v1836_v60 = vadd.f32 %v1813_v56, %v1775_v54  ;;  %v1837_v61 = vadd.f32 %v1833_v59, %v1776_v55  ;;  %v2771_v54 = vld [vmem:[%s3677_s1 + $0x78] sm:$0xf] }
 0x399   : > { %v1874_v0 = vpop.f32.mrf.mxu2  ;;  %v1894_v1 = vpop.f32.mrf.mxu3 }
 0x39a   : > { %v1897_v2 = vadd.f32 %v1874_v0, %v1836_v60  ;;  %v1898_v3 = vadd.f32 %v1894_v1, %v1837_v61 }
 0x39d   : > { %v1935_v4 = vpop.f32.mrf.mxu0  ;;  %v1955_v5 = vpop.f32.mrf.mxu1 }
 0x39e   : > { %v1958_v8 = vadd.f32 %v1935_v4, %v1897_v2  ;;  %v1959_v11 = vadd.f32 %v1955_v5, %v1898_v3  ;;  %v2786_v4 = vld [vmem:[%s3677_s1 + $0x84] sm:$0xf] }
 0x3a0   : > { %v1967_v13 = vadd.f32 %v1965_v12, %v1958_v8  ;;  %v1968_v14 = vadd.f32 %v1965_v12, %v1959_v11  ;;  %v2796_v12 = vld [vmem:[%s3677_s1 + $0x8c] sm:$0xf] }
 0x3a2   : > { %v1969_v15 = vmax.f32 %v1967_v13, 0.0  ;;  %v1970_v16 = vmax.f32 %v1968_v14, 0.0 }
 0x3a4   : > { %1983 = vrot.lane.b32.xlu2 %v1970_v16, %s2925_s9  ;;  %2089 = vrot.lane.b32.xlu0 %v1969_v15, %s2926_s10  ;;  %v2212_v48 = vmul.f32 %v1970_v16, %v3017_v6 }
 0x3a5   : > { %1981 = vrot.lane.b32.xlu1 %v1969_v15, %s2925_s9 }
 0x3ac   : > { %1971 = vrot.lane.b32.xlu2 %v1969_v15, %s2924_s6  ;;  %1973 = vrot.lane.b32.xlu0 %v1970_v16, %s2924_s6 }
 0x3ad   : > { %2091 = vrot.lane.b32.xlu1 %v1970_v16, %s2926_s10 }
 0x3b4   : > { %2152 = vrot.lane.b32.xlu2 %v1970_v16, %s2927_s11  ;;  %2327 = vrot.lane.b32.xlu0 %v1969_v15, %s2929_s13 }
 0x3b5   : > { %2150 = vrot.lane.b32.xlu1 %v1969_v15, %s2927_s11  ;;  %s188_s11 = sand.u32 1, %s2914_s16  }
 0x3bc   : > { %2266 = vrot.lane.b32.xlu2 %v1969_v15, %s2928_s12  ;;  %2268 = vrot.lane.b32.xlu0 %v1970_v16, %s2928_s12  ;;  %s2609_s12 = sshll.u32 %s188_s11, 3 }
 0x3bd   : > { %2329 = vrot.lane.b32.xlu1 %v1970_v16, %s2929_s13  ;;  %s2808_s13 = sshll.u32 %s2979_s19, 3  ;;  %s190_s30 = scalar_lea.vmem [#allocation2], %s2609_s12 }
 0x3be   : > { %s2541_s29 = scalar_lea.hbm %s3680_s4, %s2808_s13  ;;  %s2543_s5 = sshll.u32 %s190_s30, 4  ;;  %s2544_s5 = int_to_ptr.vmem [resolvable:$true] %s2543_s5 }
 0x3bf   : > { %s2545_s7 = sshll.u32 %s2541_s29, 4  ;;  %s2530_s19 = scalar_lea.sflag [#allocation3], %s188_s11  ;;  %s2546_s7 = int_to_ptr.hbm [resolvable:$true] %s2545_s7 }
 0x3c0   : > { %s2874_s8 = sshra.s32 %s2546_s7, 4  ;;  %s2875_s8 = int_to_ptr.hbm [resolvable:$true] %s2874_s8 }
 0x3c1   : > { %s2876_s22 = scalar_lea.hbm %s2875_s8, 8  ;;  %p2881_p0 = scmp.lt.s32.totalorder %s2875_s8, %s3680_s4 }
 0x3c2   : > { %p2877_p11 = scmp.ne.s32.totalorder %s2875_s8, %s2876_s22  ;;  %p2882_p1 = scmp.lt.s32.totalorder %s2880_s28, %s2876_s22 }
 0x3c4   : > { %2451 = vrot.lane.b32.xlu2 %v1970_v16, %s2931_s20  ;;  %2388 = vrot.lane.b32.xlu0 %v1969_v15, %s2930_s14  ;;  %p2878_p12 = pnand %p2877_p11, %p2996_p5  ;;  %p2883_p2 = por %p2882_p1, %p2881_p0 }
 0x3c5   : > { %2449 = vrot.lane.b32.xlu1 %v1969_v15, %s2931_s20 }
 0x3c6   : > { %p2879_p13 = pneg %p2878_p12 }
 0x3c8   : > { %p2884_p3 = pnand %p2883_p2, %p2879_p13 }
 0x3cd   : > { %2390 = vrot.lane.b32.xlu1 %v1970_v16, %s2930_s14 }
 0x3fe   : > { %v1984_v17 = vpop.permute.xlu2 %1983 }
 0x406   : > { %v1972_v24 = vpop.permute.xlu2 %1971 }
 0x416   : > { %v2090_v18 = vpop.permute.xlu0 %2089 }
 0x417   : > { %v1982_v19 = vpop.permute.xlu1 %1981 }
 0x418   : > { %v1985_v22 = vsel %vm230_vm4, %v1982_v19, %v1984_v17  ;;  %v1986_v23 = vsel %vm230_vm4, %v1984_v17, %v1982_v19  ;;  %v2791_v17 = vld [vmem:[%s3677_s1 + $0x88] sm:$0xf] }
 0x419   : > { %v1987_v25 = vmul.f32 %v1986_v23, %v3074_v43  ;;  %v1988_v26 = vmul.f32 %v1985_v22, %v3072_v42 }
 0x41b   : > { %2758 = vmatpush.msk.msrb.mxu2 %vm248_vm0, %v1987_v25  ;;  %2760 = vmatpush.msk.msrb.mxu3 %vm248_vm0, %v1988_v26 }
 0x41c   : > { %2759 = vmatmul.msk.f32.vlgmr.msrb.gmra.mxu2 %vm244_vm2, %v2757_v28  ;;  %2761 = vmatmul.msk.f32.vlgmr.msrb.gmra.mxu3 %vm244_vm2, %v2757_v28 }
 0x41e   : > { %v1974_v29 = vpop.permute.xlu0 %1973 }
 0x41f   : > { %v1975_v34 = vsel %vm209_vm1, %v1972_v24, %v1974_v29  ;;  %v1976_v43 = vsel %vm209_vm1, %v1974_v29, %v1972_v24  ;;  %v2092_v42 = vpop.permute.xlu1 %2091 }
 0x420   : > { %v1977_v35 = vmul.f32 %v1976_v43, %v3049_v31  ;;  %v1978_v36 = vmul.f32 %v1975_v34, %v3047_v30  ;;  %v2093_v37 = vsel %vm353_vm3, %v2090_v18, %v2092_v42  ;;  %v2094_v38 = vsel %vm353_vm3, %v2092_v42, %v2090_v18  ;;  %v2153_v31 = vpop.permute.xlu2 %2152 }
 0x421   : > { %v2095_v39 = vmul.f32 %v2094_v38, %v3076_v44  ;;  %v2096_v40 = vmul.f32 %v2093_v37, %v3078_v45  ;;  %v2211_v30 = vmul.f32 %v1969_v15, %v3019_v7  ;;  %v2756_v44 = vld [vmem:[%s3677_s1 + $0x6c] sm:$0xf] }
 0x422   : > { %2762 = vmatpush.msk.msra.mxu0 %vm248_vm0, %v1977_v35  ;;  %2764 = vmatpush.msk.msra.mxu1 %vm248_vm0, %v1978_v36  ;;  %v2801_v45 = vld [vmem:[%s3678_s2 + $0xc] sm:$0xf] }
 0x423   : > { %2767 = vmatpush.msk.msra.mxu2 %vm248_vm0, %v2095_v39  ;;  %2769 = vmatpush.msk.msra.mxu3 %vm248_vm0, %v2096_v40 }
 0x424   : > { %2768 = vmatmul.msk.f32.vlgmr.msra.gmra.mxu2 %vm244_vm2, %v2766_v41  ;;  %2770 = vmatmul.msk.f32.vlgmr.msra.gmra.mxu3 %vm244_vm2, %v2766_v41 }
 0x425   : > { %2777 = vmatpush.msk.msrb.mxu2 %vm248_vm0, %v2211_v30  ;;  %2779 = vmatpush.msk.msrb.mxu3 %vm248_vm0, %v2212_v48 }
 0x426   : > { %2765 = vmatmul.msk.f32.vlgmr.msra.gmra.mxu1 %vm244_vm2, %v2756_v44  ;;  %2763 = vmatmul.msk.f32.vlgmr.msra.gmra.mxu0 %vm244_vm2, %v2756_v44  ;;  %v2328_v6 = vpop.permute.xlu0 %2327 }
 0x427   : > { %v2151_v7 = vpop.permute.xlu1 %2150  ;;  %2514 = vperm.xlu2 %2859, %v2801_v45  }
 0x428   : > { %v2154_v49 = vsel %vm427_vm5, %v2151_v7, %v2153_v31  ;;  %v2155_v50 = vsel %vm427_vm5, %v2153_v31, %v2151_v7  ;;  %v2267_v55 = vpop.permute.xlu2 %2266 }
 0x429   : > { %v2156_v51 = vmul.f32 %v2155_v50, %v3103_v57  ;;  %v2157_v52 = vmul.f32 %v2154_v49, %v3105_v58 }
 0x42b   : > { %2772 = vmatpush.msk.msrb.mxu0 %vm248_vm0, %v2156_v51  ;;  %2774 = vmatpush.msk.msrb.mxu1 %vm248_vm0, %v2157_v52 }
 0x42c   : > { %2778 = vmatmul.msk.f32.vlgmr.msrb.gmra.mxu2 %vm244_vm2, %v2776_v53  ;;  %2780 = vmatmul.msk.f32.vlgmr.msrb.gmra.mxu3 %vm244_vm2, %v2776_v53 }
 0x42e   : > { %2775 = vmatmul.msk.f32.vlgmr.msrb.gmra.mxu1 %vm244_vm2, %v2771_v54  ;;  %v2269_v57 = vpop.permute.xlu0 %2268  ;;  %2773 = vmatmul.msk.f32.vlgmr.msrb.gmra.mxu0 %vm244_vm2, %v2771_v54 }
 0x42f   : > { %v2270_v58 = vsel %vm567_vm6, %v2267_v55, %v2269_v57  ;;  %v2271_v56 = vsel %vm567_vm6, %v2269_v57, %v2267_v55  ;;  %v2330_v59 = vpop.permute.xlu1 %2329 }
 0x430   : > { %v2272_v60 = vmul.f32 %v2270_v58, %v3142_v9  ;;  %v2273_v61 = vmul.f32 %v2271_v56, %v3144_v10  ;;  %v2331_v0 = vsel %vm641_vm7, %v2328_v6, %v2330_v59  ;;  %v2332_v1 = vsel %vm641_vm7, %v2330_v59, %v2328_v6  ;;  %v2781_v9 = vld [vmem:[%s3677_s1 + $0x80] sm:$0xf]  ;;  %v2452_v10 = vpop.permute.xlu2 %2451 }
 0x431   : > { %v2333_v2 = vmul.f32 %v2331_v0, %v3164_v20  ;;  %v2334_v3 = vmul.f32 %v2332_v1, %v3166_v21 }
 0x432   : > { %2782 = vmatpush.msk.msra.mxu0 %vm248_vm0, %v2272_v60  ;;  %2784 = vmatpush.msk.msra.mxu1 %vm248_vm0, %v2273_v61 }
 0x433   : > { %2787 = vmatpush.msk.msra.mxu2 %vm248_vm0, %v2333_v2  ;;  %2789 = vmatpush.msk.msra.mxu3 %vm248_vm0, %v2334_v3 }
 0x434   : > { %2788 = vmatmul.msk.f32.vlgmr.msra.gmra.mxu2 %vm244_vm2, %v2786_v4  ;;  %2790 = vmatmul.msk.f32.vlgmr.msra.gmra.mxu3 %vm244_vm2, %v2786_v4 }
 0x436   : > { %2785 = vmatmul.msk.f32.vlgmr.msra.gmra.mxu1 %vm244_vm2, %v2781_v9  ;;  %2783 = vmatmul.msk.f32.vlgmr.msra.gmra.mxu0 %vm244_vm2, %v2781_v9  ;;  %v2389_v13 = vpop.permute.xlu0 %2388 }
 0x437   : > { %v2450_v20 = vpop.permute.xlu1 %2449 }
 0x438   : > { %v2453_v21 = vsel %vm789_vm9, %v2450_v20, %v2452_v10  ;;  %v2454_v5 = vsel %vm789_vm9, %v2452_v10, %v2450_v20 }
 0x439   : > { %v2455_v8 = vmul.f32 %v2453_v21, %v3206_v46  ;;  %v2456_v11 = vmul.f32 %v2454_v5, %v3208_v47 }
 0x43b   : > { %2797 = vmatpush.msk.msrb.mxu2 %vm248_vm0, %v2455_v8  ;;  %2799 = vmatpush.msk.msrb.mxu3 %vm248_vm0, %v2456_v11 }
 0x43c   : > { %2798 = vmatmul.msk.f32.vlgmr.msrb.gmra.mxu2 %vm244_vm2, %v2796_v12  ;;  %2800 = vmatmul.msk.f32.vlgmr.msrb.gmra.mxu3 %vm244_vm2, %v2796_v12 }
 0x43f   : > { %v2391_v14 = vpop.permute.xlu1 %2390 }
 0x440   : > { %v2392_v15 = vsel %vm715_vm8, %v2389_v13, %v2391_v14  ;;  %v2393_v46 = vsel %vm715_vm8, %v2391_v14, %v2389_v13 }
 0x441   : > { %v2394_v47 = vmul.f32 %v2392_v15, %v3185_v32  ;;  %v2395_v16 = vmul.f32 %v2393_v46, %v3187_v33 }
 0x443   : > { %2792 = vmatpush.msk.msrb.mxu0 %vm248_vm0, %v2394_v47  ;;  %2794 = vmatpush.msk.msrb.mxu1 %vm248_vm0, %v2395_v16 }
 0x444   : > { %2793 = vmatmul.msk.f32.vlgmr.msrb.gmra.mxu0 %vm244_vm2, %v2791_v17  ;;  %2795 = vmatmul.msk.f32.vlgmr.msrb.gmra.mxu1 %vm244_vm2, %v2791_v17 }
 0x481   : > { %v2515_v52 = vpop.permute.xlu2 %2514 }
 0x49f   : > { %v2017_v18 = vpop.f32.mrf.mxu2  ;;  %v2037_v19 = vpop.f32.mrf.mxu3 }
 0x4a3   : > { %v2086_v27 = vpop.f32.mrf.mxu1  ;;  %v2066_v22 = vpop.f32.mrf.mxu0 }
 0x4a4   : > { %v2067_v28 = vadd.f32 %v2066_v22, %v2017_v18  ;;  %v2087_v29 = vadd.f32 %v2086_v27, %v2037_v19 }
 0x4a7   : > { %v2125_v23 = vpop.f32.mrf.mxu2  ;;  %v2145_v32 = vpop.f32.mrf.mxu3 }
 0x4a8   : > { %v2148_v34 = vadd.f32 %v2125_v23, %v2067_v28  ;;  %v2149_v43 = vadd.f32 %v2145_v32, %v2087_v29 }
 0x4ab   : > { %v2206_v24 = vpop.f32.mrf.mxu1  ;;  %v2186_v33 = vpop.f32.mrf.mxu0 }
 0x4ac   : > { %v2210_v42 = vadd.f32 %v2206_v24, %v2149_v43  ;;  %v2209_v35 = vadd.f32 %v2186_v33, %v2148_v34 }
 0x4af   : > { %v2241_v25 = vpop.f32.mrf.mxu2  ;;  %v2261_v26 = vpop.f32.mrf.mxu3 }
 0x4b0   : > { %v2264_v40 = vadd.f32 %v2241_v25, %v2209_v35  ;;  %v2265_v41 = vadd.f32 %v2261_v26, %v2210_v42 }
 0x4b3   : > { %v2322_v38 = vpop.f32.mrf.mxu1  ;;  %v2302_v39 = vpop.f32.mrf.mxu0 }
 0x4b4   : > { %v2326_v31 = vadd.f32 %v2322_v38, %v2265_v41  ;;  %v2325_v30 = vadd.f32 %v2302_v39, %v2264_v40 }
 0x4b7   : > { %v2363_v36 = vpop.f32.mrf.mxu2  ;;  %v2383_v37 = vpop.f32.mrf.mxu3 }
 0x4b8   : > { %v2386_v48 = vadd.f32 %v2363_v36, %v2325_v30  ;;  %v2387_v44 = vadd.f32 %v2383_v37, %v2326_v31 }
 0x4bf   : > { %v2485_v45 = vpop.f32.mrf.mxu2  ;;  %v2505_v6 = vpop.f32.mrf.mxu3 }
 0x4c1   : > { %v2424_v7 = vpop.f32.mrf.mxu0  ;;  %v2444_v49 = vpop.f32.mrf.mxu1 }
 0x4c2   : > { %v2447_v50 = vadd.f32 %v2424_v7, %v2386_v48  ;;  %v2448_v51 = vadd.f32 %v2444_v49, %v2387_v44 }
 0x4c4   : > { %v2508_v53 = vadd.f32 %v2485_v45, %v2447_v50  ;;  %v2509_v54 = vadd.f32 %v2505_v6, %v2448_v51 }
 0x4c6   : > { %v2517_v55 = vadd.f32 %v2515_v52, %v2508_v53  ;;  %v2518_v57 = vadd.f32 %v2515_v52, %v2509_v54 }
 0x4c8   : > { %v2519_v58 = vadd.f32 %v2517_v55, %v3355_v62  ;;  %v2520_v56 = vadd.f32 %v2518_v57, %v3357_v63 }
 0x4ca   : > { %v2522_v59 = vmax.f32 %v2520_v56, 0.0  ;;  %v2521_v60 = vmax.f32 %v2519_v58, 0.0 }
 0x4cc   : > { %v2525_v61 = vrot.slane %v2522_v59, 4 }
 0x4ce   : > { %v2526_v0 = vsel %vm248_vm0, %v2521_v60, %v2525_v61 }
 0x4cf   : > { %2528 = vst [vmem:[%s190_s30] sm:$0xff] %v2526_v0 }
 0x4d0   : > { %2887 = shalt.err (!%p2884_p3)
}
 0x4d1   : > { %2809 = dma.vmem_to_hbm [thread:$0]  (%p2996_p5), %s2544_s5, 128, %s2546_s7, %s2530_s19  }
 0x4d2 PF: > { %p2815_p4 = scmp.ge.s32.totalorder %s2922_s18, 2  ;;  %s2557_s10 = sand.u32 1, %s2910_s15  }
 0x4d3   : > { %s2558_s11 = scalar_lea.sflag [#allocation3], %s2557_s10 }
 0x4d4   : > { %p2812_p7 = pnand %p2815_p4, %p3000_p6 }
 0x4d6   : > { %p2813_p8 = pneg %p2812_p7 }
 0x4d8   : > { %2905 = dma.done.wait (%p2813_p8), %s2558_s11, 128  }
 0x4d9   : > { %2907 = vsyncadd (%p2813_p8), %s2558_s11, 4294967168  ;;  %p14_p9 = scmp.ge.s32.totalorder %s2983_s21, 4   ;;  %s3683_s15 = smov %s2914_s16 }
 0x4da   : > { %s3684_s16 = smov %s2918_s17  ;;  %s3685_s17 = smov %s2994_s24 }
 0x4db   : > { %s3686_s18 = smov %s2983_s21  ;;  %16 = sbr.rel (!%p14_p9) target bundleno = 3 (0x3), region = 117 }
 0x4e0   :  { %2564 = vsyncpa [#allocation3], 1 }
 0x4e1   :  { %2566 = vsyncpa [#allocation3 + $0x1], 1 }

</bundles_post_ra>
